<compile_context>
chip_gen: v6e
topology: v6e:2x2x1
jax: 0.10.0
libtpu: 0.0.40
codegen_flags: <defaults>
</compile_context>

<pallas_src>
import jax
import jax.numpy as jnp
from jax.experimental import pallas as pl
from jax.experimental.pallas import tpu as pltpu

MIXED_KS = (15, 31, 63)
KMAX = MIXED_KS[-1]
BN_EPS = 1e-5
LANE = 128


def _split_channels(num_chan, num_groups):
    split = [num_chan // num_groups for _ in range(num_groups)]
    split[0] += num_chan - sum(split)
    return split


def _mixed_lens(c):
    lens = []
    for n, k in zip(_split_channels(c, len(MIXED_KS)), MIXED_KS):
        lens += [k] * n
    return lens


# --------------------------- fused Pallas kernel ------------------------------
def _b77_feature_kernel(xeo_ref, xpad_ref, toe_ref, m_ref, beff_ref, pool_ref,
                        feat_ref):
    C, H, Tpad = xpad_ref.shape[1:]
    Weo = toe_ref.shape[-1]
    To, Tp = pool_ref.shape
    odd_off = Weo - To                      # lane-tile aligned (multiple of 128)

    # Stage 1: mixed 15/31/63-tap depthwise conv (BN1 scale folded into the Toeplitz)
    # as ONE batched per-channel MXU matmul over concatenated [even | odd] output
    # columns; bf16 operands, f32 accumulate; residual shortcut added in f32.
    conv = jnp.einsum('chp,cpn->chn', xpad_ref[0], toe_ref[...],
                      preferred_element_type=jnp.float32)
    y1 = xeo_ref[0] + conv                                        # (C, H, Weo) f32

    # Stages 2+3: Conv(1,2,s=2)+BN2 and Conv(nChan,1)+BN3 are both affine, pre-folded
    # into one (Q, 2*C*H) matrix with rows [even taps | odd taps]; single MXU dot.
    y1e = y1[:, :, :To].reshape(C * H, To)
    y1o = y1[:, :, odd_off:odd_off + To].reshape(C * H, To)
    yflat = jnp.concatenate([y1e, y1o], axis=0).astype(jnp.bfloat16)   # (2CH, To)
    z = jnp.dot(m_ref[...], yflat,
                preferred_element_type=jnp.float32) + beff_ref[...]    # (Q, To)
    y3 = jnp.maximum(z, 0.0)                                           # ReLU in f32

    # Stage 4: AvgPool2d((1,10),(1,10)) as a tiny f32 pooling matmul.
    feat_ref[0] = jnp.dot(y3, pool_ref[...], preferred_element_type=jnp.float32)


def _b77_feature_pallas(x_eo, xpad, toe_cat, m_cat, beff, pool):
    B, C, H, Weo = x_eo.shape
    Tpad = xpad.shape[-1]
    Q, K2 = m_cat.shape
    To, Tp = pool.shape
    return pl.pallas_call(
        _b77_feature_kernel,
        out_shape=jax.ShapeDtypeStruct((B, Q, Tp), jnp.float32),
        grid=(B,),
        in_specs=[
            pl.BlockSpec((1, C, H, Weo), lambda b: (b, 0, 0, 0)),   # shortcut (f32)
            pl.BlockSpec((1, C, H, Tpad), lambda b: (b, 0, 0, 0)),  # padded x (bf16)
            pl.BlockSpec((C, Tpad, Weo), lambda b: (0, 0, 0)),      # Toeplitz (bf16)
            pl.BlockSpec((Q, K2), lambda b: (0, 0)),                # fused mix (bf16)
            pl.BlockSpec((Q, 1), lambda b: (0, 0)),                 # fused bias (f32)
            pl.BlockSpec((To, Tp), lambda b: (0, 0)),               # pool mat  (f32)
        ],
        out_specs=pl.BlockSpec((1, Q, Tp), lambda b: (b, 0, 0)),
        compiler_params=pltpu.CompilerParams(dimension_semantics=("parallel",)),
    )(x_eo, xpad, toe_cat, m_cat, beff, pool)


# ----------------------- one-time weight folding (hoisted) --------------------
def prepare_b77(params, nTime):
    """Fold BN/bias/conv weights into the kernel operands. Run ONCE per weight set."""
    f32 = jnp.float32
    C, Kmax = params["dw1_w"].shape
    Q = params["c3_w"].shape[0]
    H = params["c3_w"].shape[2]
    T = nTime
    Tpad = T + Kmax - 1
    To = (T - 2) // 2 + 1
    Tp = To // 10

    # BN folding (running-stats inference semantics).
    s1 = params["bn1"]["gamma"] * jax.lax.rsqrt(params["bn1"]["var"] + BN_EPS)
    b1f = (params["dw1_b"] - params["bn1"]["mean"]) * s1 + params["bn1"]["beta"]
    s2 = params["bn2"]["gamma"] * jax.lax.rsqrt(params["bn2"]["var"] + BN_EPS)
    b2f = (params["c2_b"] - params["bn2"]["mean"]) * s2 + params["bn2"]["beta"]
    s3 = params["bn3"]["gamma"] * jax.lax.rsqrt(params["bn3"]["var"] + BN_EPS)
    b3f = (params["c3_b"] - params["bn3"]["mean"]) * s3 + params["bn3"]["beta"]

    # Mixed depthwise conv -> per-channel banded (Toeplitz) matrices, BN1 scale folded,
    # columns split into [even | odd] stride-2 taps; odd half placed at lane offset 128.
    p_idx = jnp.arange(Tpad)[:, None]
    t_idx = jnp.arange(T)[None, :]
    tap = p_idx - t_idx
    valid = (tap >= 0) & (tap < Kmax)
    toe = jnp.where(valid[None, :, :],
                    params["dw1_w"][:, jnp.clip(tap, 0, Kmax - 1)], 0.0)   # (C,Tpad,T)
    toe = toe * s1[:, None, None]
    toe_e = toe[:, :, 0:2 * To:2]
    toe_o = toe[:, :, 1:2 * To:2]
    odd_off = ((To + LANE - 1) // LANE) * LANE
    gap_w = jnp.zeros((C, Tpad, odd_off - To), f32)
    toe_cat = jnp.concatenate([toe_e, gap_w, toe_o], axis=-1).astype(jnp.bfloat16)

    # Fold Conv(1,2,s=2)+BN2 and Conv(nChan,1)+BN3 into one (Q, 2*C*H) contraction.
    A0 = params["c2_w"][:, :, 0, 0] * s2[:, None]            # (m, C) even tap
    A1 = params["c2_w"][:, :, 0, 1] * s2[:, None]            # (m, C) odd tap
    W3s = params["c3_w"][:, :, :, 0] * s3[:, None, None]     # (Q, m, H)
    M0 = jnp.einsum('qoh,oc->qch', W3s, A0)                  # (Q, C, H)
    M1 = jnp.einsum('qoh,oc->qch', W3s, A1)
    beff = jnp.einsum('qoh,o->q', W3s, b2f) + b3f
    beff = beff + jnp.einsum('qch,c->q', M0 + M1, b1f)       # fold stage-1 bias too
    m_cat = jnp.concatenate([M0.reshape(Q, C * H), M1.reshape(Q, C * H)],
                            axis=1).astype(jnp.bfloat16)     # (Q, 2*C*H)
    beff = beff.reshape(Q, 1).astype(f32)

    # AvgPool((1,10),(1,10)) as a fixed pooling matrix (kept f32 for output accuracy).
    tt = jnp.arange(To)[:, None]
    pp = jnp.arange(Tp)[None, :]
    pool = (jnp.where((tt // 10) == pp, 1.0, 0.0) / 10.0).astype(f32)       # (To, Tp)

    # Constrained FC: renorm rows once (idempotent for fixed weights).
    W = params["fc_w"]
    norms = jnp.sqrt(jnp.sum(W * W, axis=1, keepdims=True))
    factor = jnp.where(norms > params["max_norm"],
                       params["max_norm"] / (norms + 1e-7), 1.0)
    fc_w_eff = (W * factor).astype(f32)

    return {"toe_cat": toe_cat, "m_cat": m_cat, "beff": beff, "pool": pool,
            "fc_w": fc_w_eff, "fc_b": params["fc_b"].astype(f32)}


# ------------------------------ forward pass ----------------------------------
def b77_apply(consts, x):
    f32 = jnp.float32
    B, C, H, T = x.shape
    toe_cat, m_cat, pool = consts["toe_cat"], consts["m_cat"], consts["pool"]
    Tpad = toe_cat.shape[1]
    pad = (Tpad - T) // 2
    To, Tp = pool.shape
    Weo = toe_cat.shape[2]
    odd_off = Weo - To
    Q = m_cat.shape[0]

    # Data prep: zero-padded time axis (bf16 MXU operand) and the [even | odd]
    # shortcut samples laid out to match the Toeplitz column layout (f32 residual).
    xpad = jnp.pad(x, ((0, 0), (0, 0), (0, 0), (pad, pad))).astype(jnp.bfloat16)
    xe = x[..., 0:2 * To:2].astype(f32)
    xo = x[..., 1:2 * To:2].astype(f32)
    gap = jnp.zeros(x.shape[:-1] + (odd_off - To,), f32)
    x_eo = jnp.concatenate([xe, gap, xo], axis=-1)            # (B, C, H, Weo)

    feat = _b77_feature_pallas(x_eo, xpad, toe_cat, m_cat, consts["beff"], pool)
    feature = feat.reshape(B, Q * Tp)                         # channel-major flatten

    # Constrained FC + projection epilogue (tiny; kept in XLA on purpose).
    out = feature @ consts["fc_w"].T + consts["fc_b"]
    proj = feature                                            # projection = Identity()
    proj_n = proj / jnp.maximum(jnp.linalg.norm(proj, axis=1, keepdims=True), 1e-12)
    return out, feature, proj_n


# ------------------------------ parameter init --------------------------------
def make_dw_weight(key, lens):
    rows = []
    for c, k in enumerate(lens):
        kk = 0.1 * jax.random.normal(jax.random.fold_in(key, c), (k,), jnp.float32)
        start = (KMAX - k) // 2
        rows.append(jnp.zeros((KMAX,), jnp.float32).at[start:start + k].set(kk))
    return jnp.stack(rows)


def make_bn(key, c):
    k1, k2, k3, k4 = jax.random.split(key, 4)
    return {
        "gamma": 1.0 + 0.1 * jax.random.normal(k1, (c,), jnp.float32),
        "beta": 0.1 * jax.random.normal(k2, (c,), jnp.float32),
        "mean": 0.1 * jax.random.normal(k3, (c,), jnp.float32),
        "var": 1.0 + 0.1 * jnp.abs(jax.random.normal(k4, (c,), jnp.float32)),
    }


def init_params(key, nBands, nChan, m, nClass, feat_dim, c=0.5):
    keys = jax.random.split(key, 12)
    p = {}
    p["dw1_w"] = make_dw_weight(keys[0], _mixed_lens(nBands))     # (nBands, KMAX)
    p["dw1_b"] = 0.01 * jax.random.normal(keys[1], (nBands,), jnp.float32)
    p["bn1"] = make_bn(keys[2], nBands)
    p["c2_w"] = 0.1 * jax.random.normal(keys[3], (m, nBands, 1, 2), jnp.float32)
    p["c2_b"] = 0.01 * jax.random.normal(keys[4], (m,), jnp.float32)
    p["bn2"] = make_bn(keys[5], m)
    p["c3_w"] = 0.1 * jax.random.normal(keys[6], (2 * m, m, nChan, 1), jnp.float32)
    p["c3_b"] = 0.01 * jax.random.normal(keys[7], (2 * m,), jnp.float32)
    p["bn3"] = make_bn(keys[8], 2 * m)
    p["fc_w"] = 0.1 * jax.random.normal(keys[9], (nClass, feat_dim), jnp.float32)
    p["fc_b"] = jnp.zeros((nClass,), jnp.float32)
    p["max_norm"] = jnp.float32(c)
    return p


if __name__ == "__main__":
    # inputSize = (nBands=9, nChan=8, nTime=160), m=8, nClass=4, batch=2
    B, nBands, nChan, nTime = 2, 9, 8, 160
    m, nClass = 8, 4
    feat_dim = (2 * m) * ((nTime // 2) // 10)   # flatten of (B, 2m, 1, nTime/2/10) -> 128

    key = jax.random.PRNGKey(0)
    kx, kp = jax.random.split(key)
    x = jax.random.normal(kx, (B, nBands, nChan, nTime), jnp.float32)
    params = init_params(kp, nBands, nChan, m, nClass, feat_dim)

    consts = prepare_b77(params, nTime)          # one-time weight folding (hoisted)
    apply_fn = jax.jit(b77_apply)
    out, feature, proj_n = jax.block_until_ready(apply_fn(consts, x))

    assert out.shape == (B, nClass)
    assert feature.shape == (B, feat_dim)
    assert proj_n.shape == (B, feat_dim)
    assert bool(jnp.all(jnp.isfinite(out))) and bool(jnp.all(jnp.isfinite(feature)))
    print("KERNEL_OK")
</pallas_src>

<mosaic_0001>
module attributes {stable_mosaic.version = 11 : i64} {
  func.func @_b77_feature_kernel(%arg0: i32, %arg1: memref<1x9x8x208xf32, #tpu.memory_space<vmem>>, %arg2: memref<1x9x8x222xbf16, #tpu.memory_space<vmem>>, %arg3: memref<9x222x208xbf16, #tpu.memory_space<vmem>>, %arg4: memref<16x144xbf16, #tpu.memory_space<vmem>>, %arg5: memref<16x1xf32, #tpu.memory_space<vmem>>, %arg6: memref<80x8xf32, #tpu.memory_space<vmem>>, %arg7: memref<1x16x8xf32, #tpu.memory_space<vmem>>) attributes {dimension_semantics = [#tpu.dimension_semantics<parallel>], iteration_bounds = array<i64: 2>, scalar_prefetch = 0 : i64, scratch_operands = 0 : i64, tpu.core_type = #tpu.core_type<tc>, window_params = [{transform_indices = @transform_0, window_bounds = array<i64: 1, 9, 8, 208>}, {transform_indices = @transform_1, window_bounds = array<i64: 1, 9, 8, 222>}, {pipeline_mode = #tpu.pipeline_mode<synchronous>, transform_indices = @transform_2, window_bounds = array<i64: 9, 222, 208>}, {pipeline_mode = #tpu.pipeline_mode<synchronous>, transform_indices = @transform_3, window_bounds = array<i64: 16, 144>}, {pipeline_mode = #tpu.pipeline_mode<synchronous>, transform_indices = @transform_4, window_bounds = array<i64: 16, 1>}, {pipeline_mode = #tpu.pipeline_mode<synchronous>, transform_indices = @transform_5, window_bounds = array<i64: 80, 8>}, {transform_indices = @transform_6, window_bounds = array<i64: 1, 16, 8>}]} {
    %c0 = arith.constant 0 : index
    %c0_0 = arith.constant 0 : index
    %c0_1 = arith.constant 0 : index
    %c0_2 = arith.constant 0 : index
    %0 = vector.load %arg2[%c0, %c0_0, %c0_1, %c0_2] : memref<1x9x8x222xbf16, #tpu.memory_space<vmem>>, vector<1x9x8x222xbf16>
    %1 = vector.shape_cast %0 : vector<1x9x8x222xbf16> to vector<9x8x222xbf16>
    %c0_3 = arith.constant 0 : index
    %c0_4 = arith.constant 0 : index
    %c0_5 = arith.constant 0 : index
    %2 = vector.load %arg3[%c0_3, %c0_4, %c0_5] : memref<9x222x208xbf16, #tpu.memory_space<vmem>>, vector<9x222x208xbf16>
    "tpu.trace_start"() <{level = 10 : i32, message = "chp,cpn->chn"}> : () -> ()
    %cst = arith.constant dense<0.000000e+00> : vector<9x8x208xf32>
    %3 = tpu.matmul %1, %2, %cst {dimension_numbers = #tpu.dot_dimension_numbers<[2], [1], [1], [2], [0, 0, 0, 1, 1, 2], [0], [0]>} : vector<9x8x222xbf16>, vector<9x222x208xbf16>, vector<9x8x208xf32> -> vector<9x8x208xf32>
    "tpu.trace_stop"() : () -> ()
    %c0_6 = arith.constant 0 : index
    %c0_7 = arith.constant 0 : index
    %c0_8 = arith.constant 0 : index
    %c0_9 = arith.constant 0 : index
    %4 = vector.load %arg1[%c0_6, %c0_7, %c0_8, %c0_9] : memref<1x9x8x208xf32, #tpu.memory_space<vmem>>, vector<1x9x8x208xf32>
    %5 = vector.shape_cast %4 : vector<1x9x8x208xf32> to vector<9x8x208xf32>
    %6 = arith.addf %5, %3 : vector<9x8x208xf32>
    %7 = vector.extract_strided_slice %6 {offsets = [0, 0, 0], sizes = [9, 8, 80], strides = [1, 1, 1]} : vector<9x8x208xf32> to vector<9x8x80xf32>
    %8 = vector.shape_cast %7 : vector<9x8x80xf32> to vector<72x80xf32>
    %9 = vector.extract_strided_slice %6 {offsets = [0, 0, 128], sizes = [9, 8, 80], strides = [1, 1, 1]} : vector<9x8x208xf32> to vector<9x8x80xf32>
    %10 = vector.shape_cast %9 : vector<9x8x80xf32> to vector<72x80xf32>
    %11 = tpu.concatenate %8, %10 in 0 : vector<72x80xf32>, vector<72x80xf32> -> vector<144x80xf32>
    %12 = arith.truncf %11 : vector<144x80xf32> to vector<144x80xbf16>
    %c0_10 = arith.constant 0 : index
    %c0_11 = arith.constant 0 : index
    %13 = vector.load %arg4[%c0_10, %c0_11] : memref<16x144xbf16, #tpu.memory_space<vmem>>, vector<16x144xbf16>
    %cst_12 = arith.constant dense<0.000000e+00> : vector<16x80xf32>
    %14 = tpu.matmul %13, %12, %cst_12 {dimension_numbers = #tpu.dot_dimension_numbers<[1], [0], [0], [1], [0, 0, 1, 1], [], []>} : vector<16x144xbf16>, vector<144x80xbf16>, vector<16x80xf32> -> vector<16x80xf32>
    %c0_13 = arith.constant 0 : index
    %c0_14 = arith.constant 0 : index
    %15 = vector.load %arg5[%c0_13, %c0_14] : memref<16x1xf32, #tpu.memory_space<vmem>>, vector<16x1xf32>
    %16 = vector.broadcast %15 : vector<16x1xf32> to vector<16x80xf32>
    %17 = arith.addf %14, %16 : vector<16x80xf32>
    %cst_15 = arith.constant 0.000000e+00 : f32
    %18 = vector.broadcast %cst_15 : f32 to vector<16x80xf32>
    %19 = arith.maximumf %17, %18 : vector<16x80xf32>
    %c0_16 = arith.constant 0 : index
    %c0_17 = arith.constant 0 : index
    %20 = vector.load %arg6[%c0_16, %c0_17] : memref<80x8xf32, #tpu.memory_space<vmem>>, vector<80x8xf32>
    %cst_18 = arith.constant dense<0.000000e+00> : vector<16x8xf32>
    %21 = tpu.matmul %19, %20, %cst_18 {dimension_numbers = #tpu.dot_dimension_numbers<[1], [0], [0], [1], [0, 0, 1, 1], [], []>} : vector<16x80xf32>, vector<80x8xf32>, vector<16x8xf32> -> vector<16x8xf32>
    %c0_19 = arith.constant 0 : index
    %c0_20 = arith.constant 0 : index
    %c0_21 = arith.constant 0 : index
    %22 = vector.load %arg7[%c0_19, %c0_20, %c0_21] : memref<1x16x8xf32, #tpu.memory_space<vmem>>, vector<1x16x8xf32>
    %23 = vector.shape_cast %22 : vector<1x16x8xf32> to vector<16x8xf32>
    %24 = vector.shape_cast %21 : vector<16x8xf32> to vector<1x16x8xf32>
    tpu.vector_store %arg7[%c0_19, %c0_20, %c0_21], %24 {strides = array<i32>} : memref<1x16x8xf32, #tpu.memory_space<vmem>>, vector<1x16x8xf32>,
    return
  }
  func.func @transform_0(%arg0: i32) -> (i32, i32, i32, i32) {
    %c0_i32 = arith.constant 0 : i32
    %c0_i32_0 = arith.constant 0 : i32
    %c0_i32_1 = arith.constant 0 : i32
    %c0_i32_2 = arith.constant 0 : i32
    return %arg0, %c0_i32, %c0_i32_0, %c0_i32_1 : i32, i32, i32, i32
  }
  func.func @transform_1(%arg0: i32) -> (i32, i32, i32, i32) {
    %c0_i32 = arith.constant 0 : i32
    %c0_i32_0 = arith.constant 0 : i32
    %c0_i32_1 = arith.constant 0 : i32
    %c0_i32_2 = arith.constant 0 : i32
    return %arg0, %c0_i32, %c0_i32_0, %c0_i32_1 : i32, i32, i32, i32
  }
  func.func @transform_2(%arg0: i32) -> (i32, i32, i32) {
    %c0_i32 = arith.constant 0 : i32
    %c0_i32_0 = arith.constant 0 : i32
    %c0_i32_1 = arith.constant 0 : i32
    %c0_i32_2 = arith.constant 0 : i32
    return %c0_i32, %c0_i32_0, %c0_i32_1 : i32, i32, i32
  }
  func.func @transform_3(%arg0: i32) -> (i32, i32) {
    %c0_i32 = arith.constant 0 : i32
    %c0_i32_0 = arith.constant 0 : i32
    %c0_i32_1 = arith.constant 0 : i32
    return %c0_i32, %c0_i32_0 : i32, i32
  }
  func.func @transform_4(%arg0: i32) -> (i32, i32) {
    %c0_i32 = arith.constant 0 : i32
    %c0_i32_0 = arith.constant 0 : i32
    %c0_i32_1 = arith.constant 0 : i32
    return %c0_i32, %c0_i32_0 : i32, i32
  }
  func.func @transform_5(%arg0: i32) -> (i32, i32) {
    %c0_i32 = arith.constant 0 : i32
    %c0_i32_0 = arith.constant 0 : i32
    %c0_i32_1 = arith.constant 0 : i32
    return %c0_i32, %c0_i32_0 : i32, i32
  }
  func.func @transform_6(%arg0: i32) -> (i32, i32, i32) {
    %c0_i32 = arith.constant 0 : i32
    %c0_i32_0 = arith.constant 0 : i32
    %c0_i32_1 = arith.constant 0 : i32
    return %arg0, %c0_i32, %c0_i32_0 : i32, i32, i32
  }
}

</mosaic_0001>

<bundles_post_ra>
// kernel: b77_apply.1
= control target key start
LH: loop header
LB: loop body
LE: loop exit
PB: predicated region body
PF: predicated region fallthrough
CT: control target
= control target key end

     0   :  { %s3354_s21 = smov 0   ;;  %s4312_s0 = inlined_call_operand.vmem [shape: f32[2,9,8,208], index: 0, kind: input, shape index: {}]   ;;  %s4313_s1 = inlined_call_operand.vmem [shape: bf16[2,9,8,222], index: 1, kind: input, shape index: {}]   ;;  %s4314_s2 = inlined_call_operand.vmem [shape: bf16[9,222,208], index: 2, kind: input, shape index: {}]   ;;  %s4315_s3 = inlined_call_operand.vmem [shape: bf16[16,144], index: 3, kind: input, shape index: {}]   ;;  %s4316_s4 = inlined_call_operand.vmem [shape: f32[16,1], index: 4, kind: input, shape index: {}]   ;;  %s4317_s5 = inlined_call_operand.vmem [shape: f32[80,8], index: 5, kind: input, shape index: {}]   ;;  %s4318_s6 = inlined_call_operand.vmem [shape: f32[2,16,8], index: 6, kind: output, shape index: {}]  }
   0x1 LB: > { %s2559_s22 = sadd.s32 4294967295, %s3316_s21   ;;  %p2563_p0 = scmp.ge.s32.totalorder %s3316_s21, 1  ;;  %s3316_s21 = sphi %s3354_s21, %s16_s21  }
   0x2   : > { %p222_p1 = scmp.lt.s32.totalorder %s3316_s21, 3 }
   0x4   : > { %p223_p2 = pnand %p2563_p0, %p222_p1 }
   0x5   : > { %p257_p3 = scmp.lt.s32.totalorder (!%p223_p2), %s2559_s22, 1 }
   0x6   : > { %226 = sbr.rel (%p223_p2) target bundleno = 909 (0x38d), region = 44 }
   0xb   : > { %v2911_v0 = vld [vmem:[%s4314_s2 + $0x74] ss:$8 sps:$4 sm:$0xff]   ;;  %v2913_v1 = vld [vmem:[%s4314_s2 + $0x70] ss:$8 sps:$4 sm:$0xff]   ;;  %v2917_v4 = vld [vmem:[%s4314_s2 + $0x64] ss:$8 sps:$4 sm:$0xff]  }
   0xc   : > { %689 = vmatprep.subr.bf16.mxu0 %v2911_v0  ;;  %v2914_v2 = vld [vmem:[%s4314_s2 + $0x154] ss:$8 sps:$4 sm:$0xff]   ;;  %v2916_v3 = vld [vmem:[%s4314_s2 + $0x150] ss:$8 sps:$4 sm:$0xff]   ;;  %v2919_v5 = vld [vmem:[%s4314_s2 + $0x60] ss:$8 sps:$4 sm:$0xff]  }
   0xd   : > { %690 = vmatpush1.bf16.msra.mxu0 %v2913_v1  ;;  %883 = vmatprep.subr.bf16.mxu1 %v2914_v2  ;;  %v2920_v6 = vld [vmem:[%s4314_s2 + $0x144] ss:$8 sps:$4 sm:$0xff]   ;;  %v2922_v7 = vld [vmem:[%s4314_s2 + $0x140] ss:$8 sps:$4 sm:$0xff]   ;;  %v2923_v8 = vld [vmem:[%s4314_s2 + $0x54] ss:$8 sps:$4 sm:$0xff]  }
   0xe   : > { %884 = vmatpush1.bf16.msra.mxu1 %v2916_v3  ;;  %691 = vmatprep.subr.bf16.mxu0 %v2917_v4  ;;  %v2925_v9 = vld [vmem:[%s4314_s2 + $0x50] ss:$8 sps:$4 sm:$0xff]   ;;  %v2926_v10 = vld [vmem:[%s4314_s2 + $0x134] ss:$8 sps:$4 sm:$0xff]   ;;  %v2929_v11 = vld [vmem:[%s4314_s2 + $0x44] ss:$8 sps:$4 sm:$0xff]  }
   0xf   : > { %885 = vmatprep.subr.bf16.mxu1 %v2920_v6  ;;  %v2928_v12 = vld [vmem:[%s4314_s2 + $0x130] ss:$8 sps:$4 sm:$0xff]   ;;  %v2932_v13 = vld [vmem:[%s4314_s2 + $0x124] ss:$8 sps:$4 sm:$0xff]   ;;  %v2931_v14 = vld [vmem:[%s4314_s2 + $0x40] ss:$8 sps:$4 sm:$0xff]  }
  0x10   : > { %v2935_v15 = vld [vmem:[%s4314_s2 + $0x34] ss:$8 sps:$4 sm:$0xff]   ;;  %v2934_v16 = vld [vmem:[%s4314_s2 + $0x120] ss:$8 sps:$4 sm:$0xff]   ;;  %v2937_v18 = vld [vmem:[%s4314_s2 + $0x30] ss:$8 sps:$4 sm:$0xff]  }
  0x11   : > { %692 = vmatpush1.bf16.msra.mxu0 %v2919_v5  ;;  %v2938_v17 = vld [vmem:[%s4314_s2 + $0x114] ss:$8 sps:$4 sm:$0xff]   ;;  %v2941_v19 = vld [vmem:[%s4314_s2 + $0x24] ss:$8 sps:$4 sm:$0xff]   ;;  %v2940_v20 = vld [vmem:[%s4314_s2 + $0x110] ss:$8 sps:$4 sm:$0xff]  }
  0x12   : > { %693 = vmatprep.subr.bf16.mxu0 %v2923_v8  ;;  %886 = vmatpush1.bf16.msra.mxu1 %v2922_v7  ;;  %v2944_v21 = vld [vmem:[%s4314_s2 + $0x104] ss:$8 sps:$4 sm:$0xff]   ;;  %v2943_v22 = vld [vmem:[%s4314_s2 + $0x20] ss:$8 sps:$4 sm:$0xff]   ;;  %v2947_v23 = vld [vmem:[%s4314_s2 + $0x14] ss:$8 sps:$4 sm:$0xff]  }
  0x13   : > { %887 = vmatprep.subr.bf16.mxu1 %v2926_v10  ;;  %v2946_v24 = vld [vmem:[%s4314_s2 + $0x100] ss:$8 sps:$4 sm:$0xff]   ;;  %v2950_v25 = vld [vmem:[%s4314_s2 + $0xf4] ss:$8 sps:$4 sm:$0xff]   ;;  %v2949_v26 = vld [vmem:[%s4314_s2 + $0x10] ss:$8 sps:$4 sm:$0xff]  }
  0x14   : > { %v2953_v27 = vld [vmem:[%s4314_s2 + $0x4] ss:$8 sps:$4 sm:$0xff]   ;;  %v2952_v28 = vld [vmem:[%s4314_s2 + $0xf0] ss:$8 sps:$4 sm:$0xff]   ;;  %v2955_v29 = vld [vmem:[%s4314_s2] ss:$8 sps:$4 sm:$0xff]  }
  0x15   : > { %694 = vmatpush1.bf16.msra.mxu0 %v2925_v9  ;;  %v2956_v30 = vld [vmem:[%s4314_s2 + $0xe4] ss:$8 sps:$4 sm:$0xff]   ;;  %s4320_s22 = smov (!%p257_p3, %s2559_s22), 1  ;;  %v2959_v31 = vld [vmem:[%s4314_s2 + $0xd4] ss:$8 sps:$4 sm:$0x7f]  }
  0x16   : > { %695 = vmatprep.subr.bf16.mxu0 %v2929_v11  ;;  %888 = vmatpush1.bf16.msra.mxu1 %v2928_v12  ;;  %vm682_vm0 = vcmask 1046528   ;;  %v2961_v32 = vld [vmem:[%s4314_s2 + $0xd0] ss:$8 sps:$4 sm:$0x7f]   ;;  %v2958_v33 = vld [vmem:[%s4314_s2 + $0xe0] ss:$8 sps:$4 sm:$0xff]  }
  0x17   : > { %889 = vmatprep.subr.bf16.mxu1 %v2932_v13  ;;  %v2962_v34 = vld [vmem:[%s4314_s2 + $0x1b4] ss:$8 sps:$4 sm:$0x7f]   ;;  %v2964_v35 = vld [vmem:[%s4314_s2 + $0x1b0] ss:$8 sps:$4 sm:$0x7f]  }
  0x18   : > { %s2900_s29 = smul.u32 72, %s4320_s22  ;;  %v684_v36 = vsel %vm682_vm0, %v2961_v32, 0  ;;  %v2965_v37 = vld [vmem:[%s4314_s2 + $0xc4] ss:$8 sps:$4 sm:$0xff]   ;;  %v878_v38 = vsel %vm682_vm0, %v2964_v35, 0  ;;  %vm678_vm1 = vcmask 769024  }
  0x19   : > { %696 = vmatpush1.bf16.msra.mxu0 %v2931_v14  ;;  %v2968_v39 = vld [vmem:[%s4314_s2 + $0x1a4] ss:$8 sps:$4 sm:$0xff]   ;;  %v2967_v40 = vld [vmem:[%s4314_s2 + $0xc0] ss:$8 sps:$4 sm:$0xff]   ;;  %v2971_v41 = vld [vmem:[%s4314_s2 + $0xb4] ss:$8 sps:$4 sm:$0xff]  }
  0x1a   : > { %697 = vmatprep.subr.bf16.mxu0 %v2935_v15  ;;  %890 = vmatpush1.bf16.msra.mxu1 %v2934_v16  ;;  %s3490_s12 = scalar_lea.vmem %s4313_s1, %s2900_s29  ;;  %v2970_v42 = vld [vmem:[%s4314_s2 + $0x1a0] ss:$8 sps:$4 sm:$0xff]   ;;  %v2974_v43 = vld [vmem:[%s4314_s2 + $0x194] ss:$8 sps:$4 sm:$0xff]   ;;  %v2973_v47 = vld [vmem:[%s4314_s2 + $0xb0] ss:$8 sps:$4 sm:$0xff]  }
  0x1b   : > { %891 = vmatprep.subr.bf16.mxu1 %v2938_v17  ;;  %v273_v44 = vld [vmem:[%s3490_s12] sm:$0xff]  ;;  %v274_v46 = vld [vmem:[%s3490_s12 + $0x8] sm:$0xff]  ;;  %v2976_v50 = vld [vmem:[%s4314_s2 + $0x190] ss:$8 sps:$4 sm:$0xff]   ;;  %s2899_s30 = smul.u32 144, %s4320_s22  ;;  %vm2350_vm2 = vcmask 130048  }
  0x1c   : > { %v2569_v45 = vcombine.high %v273_v44, %v273_v44  ;;  %v2601_v48 = vcombine.high %v274_v46, %v274_v46  ;;  %v2977_v49 = vld [vmem:[%s4314_s2 + $0xa4] ss:$8 sps:$4 sm:$0xff]   ;;  %v2979_v52 = vld [vmem:[%s4314_s2 + $0xa0] ss:$8 sps:$4 sm:$0xff]   ;;  %v2983_v53 = vld [vmem:[%s4314_s2 + $0x94] ss:$8 sps:$4 sm:$0xff]   ;;  %v2568_v63 = vcombine.low %v273_v44, %v273_v44  ;;  %v2600_v2 = vcombine.low %v274_v46, %v274_v46 }
  0x1d   : > { %698 = vmatpush1.bf16.msra.mxu0 %v2937_v18  ;;  %v2980_v51 = vld [vmem:[%s4314_s2 + $0x184] ss:$8 sps:$4 sm:$0xff]   ;;  %v2982_v54 = vld [vmem:[%s4314_s2 + $0x180] ss:$8 sps:$4 sm:$0xff]   ;;  %v2986_v55 = vld [vmem:[%s4314_s2 + $0x174] ss:$8 sps:$4 sm:$0xff]   ;;  %s4163_s13 = scalar_lea.vmem %s4312_s0, %s2899_s30 }
  0x1e   : > { %699 = vmatprep.subr.bf16.mxu0 %v2941_v19  ;;  %892 = vmatpush1.bf16.msra.mxu1 %v2940_v20  ;;  %v2985_v56 = vld [vmem:[%s4314_s2 + $0x90] ss:$8 sps:$4 sm:$0xff]   ;;  %v2989_v57 = vld [vmem:[%s4314_s2 + $0x84] ss:$8 sps:$4 sm:$0xff]   ;;  %v2991_v60 = vld [vmem:[%s4314_s2 + $0x80] ss:$8 sps:$4 sm:$0xff]  }
  0x1f   : > { %893 = vmatprep.subr.bf16.mxu1 %v2944_v21  ;;  %2599 = vmatprep.mubr.msk.bf16.mxu0 %vm678_vm1, %v2569_v45  ;;  %v2988_v58 = vld [vmem:[%s4314_s2 + $0x170] ss:$8 sps:$4 sm:$0xff]   ;;  %v2992_v59 = vld [vmem:[%s4314_s2 + $0x164] ss:$8 sps:$4 sm:$0xff]   ;;  %v3001_v61 = vld [vmem:[%s4314_s2 + $0x234] ss:$8 sps:$4 sm:$0xff]  }
  0x20   : > { %2631 = vmatprep.mubr.msk.bf16.mxu1 %vm678_vm1, %v2601_v48  ;;  %v2994_v62 = vld [vmem:[%s4314_s2 + $0x160] ss:$8 sps:$4 sm:$0xff]   ;;  %v3004_v0 = vld [vmem:[%s4314_s2 + $0x314] ss:$8 sps:$4 sm:$0xff]   ;;  %v2999_v1 = vld [vmem:[%s4314_s2 + $0x230] ss:$8 sps:$4 sm:$0xff]  }
  0x21   : > { %700 = vmatpush1.bf16.msra.mxu0 %v2943_v22  ;;  %v3007_v3 = vld [vmem:[%s4314_s2 + $0x224] ss:$8 sps:$4 sm:$0xff]   ;;  %v3002_v4 = vld [vmem:[%s4314_s2 + $0x310] ss:$8 sps:$4 sm:$0xff]   ;;  %v3005_v6 = vld [vmem:[%s4314_s2 + $0x220] ss:$8 sps:$4 sm:$0xff]  }
  0x22   : > { %701 = vmatprep.subr.bf16.mxu0 %v2947_v23  ;;  %894 = vmatpush1.bf16.msra.mxu1 %v2946_v24  ;;  %v3010_v5 = vld [vmem:[%s4314_s2 + $0x304] ss:$8 sps:$4 sm:$0xff]   ;;  %v3013_v7 = vld [vmem:[%s4314_s2 + $0x214] ss:$8 sps:$4 sm:$0xff]   ;;  %v3008_v8 = vld [vmem:[%s4314_s2 + $0x300] ss:$8 sps:$4 sm:$0xff]  }
  0x23   : > { %895 = vmatprep.subr.bf16.mxu1 %v2950_v25  ;;  %v3016_v9 = vld [vmem:[%s4314_s2 + $0x2f4] ss:$8 sps:$4 sm:$0xff]   ;;  %v3011_v10 = vld [vmem:[%s4314_s2 + $0x210] ss:$8 sps:$4 sm:$0xff]   ;;  %v3019_v11 = vld [vmem:[%s4314_s2 + $0x204] ss:$8 sps:$4 sm:$0xff]  }
  0x24   : > { %v3014_v12 = vld [vmem:[%s4314_s2 + $0x2f0] ss:$8 sps:$4 sm:$0xff]   ;;  %v3022_v13 = vld [vmem:[%s4314_s2 + $0x2e4] ss:$8 sps:$4 sm:$0xff]   ;;  %v3017_v14 = vld [vmem:[%s4314_s2 + $0x200] ss:$8 sps:$4 sm:$0xff]  }
  0x25   : > { %702 = vmatpush1.bf16.msra.mxu0 %v2949_v26  ;;  %v3025_v15 = vld [vmem:[%s4314_s2 + $0x1f4] ss:$8 sps:$4 sm:$0xff]   ;;  %v3020_v16 = vld [vmem:[%s4314_s2 + $0x2e0] ss:$8 sps:$4 sm:$0xff]   ;;  %v3023_v18 = vld [vmem:[%s4314_s2 + $0x1f0] ss:$8 sps:$4 sm:$0xff]  }
  0x26   : > { %703 = vmatprep.subr.bf16.mxu0 %v2953_v27  ;;  %896 = vmatpush1.bf16.msra.mxu1 %v2952_v28  ;;  %v3028_v17 = vld [vmem:[%s4314_s2 + $0x2d4] ss:$8 sps:$4 sm:$0xff]   ;;  %v3031_v19 = vld [vmem:[%s4314_s2 + $0x1e4] ss:$8 sps:$4 sm:$0xff]   ;;  %v3026_v20 = vld [vmem:[%s4314_s2 + $0x2d0] ss:$8 sps:$4 sm:$0xff]  }
  0x27   : > { %897 = vmatprep.subr.bf16.mxu1 %v2956_v30  ;;  %v3034_v21 = vld [vmem:[%s4314_s2 + $0x2c4] ss:$8 sps:$4 sm:$0xff]   ;;  %v3029_v22 = vld [vmem:[%s4314_s2 + $0x1e0] ss:$8 sps:$4 sm:$0xff]   ;;  %v3037_v23 = vld [vmem:[%s4314_s2 + $0x1d4] ss:$8 sps:$4 sm:$0xff]  }
  0x28   : > { %v3623_v24 = vld [vmem:[%s3490_s12 + $0x10] sm:$0xff]  ;;  %v3626_v25 = vld [vmem:[%s3490_s12 + $0x18] sm:$0xff]  ;;  %v3032_v26 = vld [vmem:[%s4314_s2 + $0x2c0] ss:$8 sps:$4 sm:$0xff]   ;;  %vm2407_vm3 = vcmask 654336   ;;  %s2863_s7 = sshll.u32 %s4320_s22, 4 }
  0x29   : > { %704 = vmatpush1.bf16.msra.mxu0 %v2955_v29  ;;  %v2633_v27 = vcombine.high %v3623_v24, %v3623_v24  ;;  %v2665_v28 = vcombine.high %v3626_v25, %v3626_v25  ;;  %v3040_v29 = vld [vmem:[%s4314_s2 + $0x2b4] ss:$8 sps:$4 sm:$0xff]   ;;  %v3035_v30 = vld [vmem:[%s4314_s2 + $0x1d0] ss:$8 sps:$4 sm:$0xff]   ;;  %v3053_v44 = vld [vmem:[%s4314_s2 + $0x280] ss:$8 sps:$4 sm:$0xff]   ;;  %s271_s9 = scalar_lea.vmem %s4318_s6, %s2863_s7 }
  0x2a   : > { %2598 = vmatprep.subr.msk.bf16.mxu0 %vm682_vm0, %v2959_v31  ;;  %898 = vmatpush1.bf16.msra.mxu1 %v2958_v33  ;;  %v3043_v31 = vld [vmem:[%s4314_s2 + $0x1c4] ss:$8 sps:$4 sm:$0xff]   ;;  %v3038_v32 = vld [vmem:[%s4314_s2 + $0x2b0] ss:$8 sps:$4 sm:$0xff]   ;;  %v3041_v33 = vld [vmem:[%s4314_s2 + $0x1c0] ss:$8 sps:$4 sm:$0xff]  }
  0x2b   : > { %2630 = vmatprep.subr.msk.bf16.mxu1 %vm682_vm0, %v2962_v34  ;;  %v3046_v34 = vld [vmem:[%s4314_s2 + $0x2a4] ss:$8 sps:$4 sm:$0xff]   ;;  %v3047_v35 = vld [vmem:[%s4314_s2 + $0x294] ss:$8 sps:$4 sm:$0x7f]   ;;  %vm2489_vm4 = vcmask 64512  }
  0x2c   : > { %v3061_v45 = vld [vmem:[%s4314_s2 + $0x274] ss:$8 sps:$4 sm:$0xff]   ;;  %v3056_v46 = vld [vmem:[%s4314_s2 + $0x360] ss:$8 sps:$4 sm:$0xff]   ;;  %v3059_v48 = vld [vmem:[%s4314_s2 + $0x270] ss:$8 sps:$4 sm:$0xff]  }
  0x2d   : > { %710 = vmatpush2.bf16.msra.mxu0 %v684_v36  ;;  %v3049_v36 = vld [vmem:[%s4314_s2 + $0x290] ss:$8 sps:$4 sm:$0x7f]  }
  0x2e   : > { %711 = vmatprep.subr.bf16.mxu0 %v2965_v37  ;;  %904 = vmatpush2.bf16.msra.mxu1 %v878_v38  ;;  %v3044_v37 = vld [vmem:[%s4314_s2 + $0x2a0] ss:$8 sps:$4 sm:$0xff]   ;;  %v3050_v38 = vld [vmem:[%s4314_s2 + $0x374] ss:$8 sps:$4 sm:$0x7f]  }
  0x2f   : > { %905 = vmatprep.subr.bf16.mxu1 %v2968_v39  ;;  %v3052_v39 = vld [vmem:[%s4314_s2 + $0x370] ss:$8 sps:$4 sm:$0x7f]  }
  0x31   : > { %712 = vmatpush2.bf16.msra.mxu0 %v2967_v40  ;;  %v1072_v40 = vsel %vm682_vm0, %v3049_v36, 0  ;;  %v3137_v36 = vld [vmem:[%s4314_s2 + $0x450] ss:$8 sps:$4 sm:$0x7f]  }
  0x32   : > { %713 = vmatprep.subr.bf16.mxu0 %v2971_v41  ;;  %906 = vmatpush2.bf16.msra.mxu1 %v2970_v42  ;;  %v3055_v41 = vld [vmem:[%s4314_s2 + $0x284] ss:$8 sps:$4 sm:$0xff]   ;;  %v1266_v42 = vsel %vm682_vm0, %v3052_v39, 0  ;;  %v3140_v39 = vld [vmem:[%s4314_s2 + $0x530] ss:$8 sps:$4 sm:$0x7f]  }
  0x33   : > { %907 = vmatprep.subr.bf16.mxu1 %v2974_v43  ;;  %v3058_v43 = vld [vmem:[%s4314_s2 + $0x364] ss:$8 sps:$4 sm:$0xff]  }
  0x35   : > { %714 = vmatpush2.bf16.msra.mxu0 %v2973_v47  ;;  %v3064_v47 = vld [vmem:[%s4314_s2 + $0x354] ss:$8 sps:$4 sm:$0xff]  }
  0x36   : > { %715 = vmatprep.subr.bf16.mxu0 %v2977_v49  ;;  %908 = vmatpush2.bf16.msra.mxu1 %v2976_v50  ;;  %v3067_v49 = vld [vmem:[%s4314_s2 + $0x264] ss:$8 sps:$4 sm:$0xff]   ;;  %v3062_v50 = vld [vmem:[%s4314_s2 + $0x350] ss:$8 sps:$4 sm:$0xff]  }
  0x37   : > { %909 = vmatprep.subr.bf16.mxu1 %v2980_v51  ;;  %v3070_v51 = vld [vmem:[%s4314_s2 + $0x344] ss:$8 sps:$4 sm:$0xff]  }
  0x39   : > { %716 = vmatpush2.bf16.msra.mxu0 %v2979_v52  ;;  %v3065_v52 = vld [vmem:[%s4314_s2 + $0x260] ss:$8 sps:$4 sm:$0xff]  }
  0x3a   : > { %717 = vmatprep.subr.bf16.mxu0 %v2983_v53  ;;  %910 = vmatpush2.bf16.msra.mxu1 %v2982_v54  ;;  %v3073_v53 = vld [vmem:[%s4314_s2 + $0x254] ss:$8 sps:$4 sm:$0xff]   ;;  %v3068_v54 = vld [vmem:[%s4314_s2 + $0x340] ss:$8 sps:$4 sm:$0xff]  }
  0x3b   : > { %911 = vmatprep.subr.bf16.mxu1 %v2986_v55  ;;  %v3076_v55 = vld [vmem:[%s4314_s2 + $0x334] ss:$8 sps:$4 sm:$0xff]  }
  0x3d   : > { %718 = vmatpush2.bf16.msra.mxu0 %v2985_v56  ;;  %v3071_v56 = vld [vmem:[%s4314_s2 + $0x250] ss:$8 sps:$4 sm:$0xff]  }
  0x3e   : > { %719 = vmatprep.subr.bf16.mxu0 %v2989_v57  ;;  %912 = vmatpush2.bf16.msra.mxu1 %v2988_v58  ;;  %v3079_v57 = vld [vmem:[%s4314_s2 + $0x244] ss:$8 sps:$4 sm:$0xff]   ;;  %v3074_v58 = vld [vmem:[%s4314_s2 + $0x330] ss:$8 sps:$4 sm:$0xff]  }
  0x3f   : > { %913 = vmatprep.subr.bf16.mxu1 %v2992_v59  ;;  %v3082_v59 = vld [vmem:[%s4314_s2 + $0x324] ss:$8 sps:$4 sm:$0xff]  }
  0x41   : > { %720 = vmatpush2.bf16.msra.mxu0 %v2991_v60  ;;  %v3077_v60 = vld [vmem:[%s4314_s2 + $0x240] ss:$8 sps:$4 sm:$0xff]  }
  0x42   : > { %1077 = vmatprep.subr.bf16.mxu0 %v3001_v61  ;;  %914 = vmatpush2.bf16.msra.mxu1 %v2994_v62  ;;  %v3088_v61 = vld [vmem:[%s4314_s2 + $0x3f4] ss:$8 sps:$4 sm:$0xff]   ;;  %v3080_v62 = vld [vmem:[%s4314_s2 + $0x320] ss:$8 sps:$4 sm:$0xff]  }
  0x43   : > { %1271 = vmatprep.subr.bf16.mxu1 %v3004_v0  ;;  %v3092_v0 = vld [vmem:[%s4314_s2 + $0x4d4] ss:$8 sps:$4 sm:$0xff]  }
  0x44   : > { %722 = vmatmul.mubr.bf16.vlgmr.msra.gmra.mxu0 %v2568_v63  ;;  %v2632_v63 = vcombine.low %v3623_v24, %v3623_v24  ;;  %v3114_v24 = vld [vmem:[%s4314_s2 + $0x490] ss:$8 sps:$4 sm:$0xff]  }
  0x45   : > { %1078 = vmatpush1.bf16.msra.mxu0 %v2999_v1  ;;  %916 = vmatmul.mubr.bf16.vlgmr.msra.gmra.mxu1 %v2600_v2  ;;  %v3086_v1 = vld [vmem:[%s4314_s2 + $0x3f0] ss:$8 sps:$4 sm:$0xff]   ;;  %v2664_v2 = vcombine.low %v3626_v25, %v3626_v25  ;;  %v3122_v25 = vld [vmem:[%s4314_s2 + $0x484] ss:$8 sps:$4 sm:$0xff]  }
  0x46   : > { %1079 = vmatprep.subr.bf16.mxu0 %v3007_v3  ;;  %1272 = vmatpush1.bf16.msra.mxu1 %v3002_v4  ;;  %v3095_v3 = vld [vmem:[%s4314_s2 + $0x3e4] ss:$8 sps:$4 sm:$0xff]   ;;  %v3090_v4 = vld [vmem:[%s4314_s2 + $0x4d0] ss:$8 sps:$4 sm:$0xff]  }
  0x47   : > { %1273 = vmatprep.subr.bf16.mxu1 %v3010_v5  ;;  %2663 = vmatprep.mubr.msk.bf16.mxu0 %vm678_vm1, %v2633_v27  ;;  %v3098_v5 = vld [vmem:[%s4314_s2 + $0x4c4] ss:$8 sps:$4 sm:$0xff]   ;;  %v3125_v27 = vld [vmem:[%s4314_s2 + $0x394] ss:$8 sps:$4 sm:$0xff]  }
  0x48   : > { %2695 = vmatprep.mubr.msk.bf16.mxu1 %vm678_vm1, %v2665_v28  ;;  %v3120_v28 = vld [vmem:[%s4314_s2 + $0x480] ss:$8 sps:$4 sm:$0xff]  }
  0x49   : > { %1080 = vmatpush1.bf16.msra.mxu0 %v3005_v6  ;;  %v3757_v6 = vld [vmem:[%s3490_s12 + $0x20] sm:$0xff] }
  0x4a   : > { %1081 = vmatprep.subr.bf16.mxu0 %v3013_v7  ;;  %1274 = vmatpush1.bf16.msra.mxu1 %v3008_v8  ;;  %v3760_v7 = vld [vmem:[%s3490_s12 + $0x28] sm:$0xff] }
  0x4b   : > { %1275 = vmatprep.subr.bf16.mxu1 %v3016_v9  ;;  %v3093_v8 = vld [vmem:[%s4314_s2 + $0x3e0] ss:$8 sps:$4 sm:$0xff]   ;;  %v2697_v9 = vcombine.high %v3757_v6, %v3757_v6 }
  0x4d   : > { %1082 = vmatpush1.bf16.msra.mxu0 %v3011_v10  ;;  %v2729_v10 = vcombine.high %v3760_v7, %v3760_v7 }
  0x4e   : > { %1083 = vmatprep.subr.bf16.mxu0 %v3019_v11  ;;  %1276 = vmatpush1.bf16.msra.mxu1 %v3014_v12  ;;  %v3101_v11 = vld [vmem:[%s4314_s2 + $0x3d4] ss:$8 sps:$4 sm:$0xff]   ;;  %v3096_v12 = vld [vmem:[%s4314_s2 + $0x4c0] ss:$8 sps:$4 sm:$0xff]  }
  0x4f   : > { %1277 = vmatprep.subr.bf16.mxu1 %v3022_v13  ;;  %v3104_v13 = vld [vmem:[%s4314_s2 + $0x4b4] ss:$8 sps:$4 sm:$0xff]  }
  0x51   : > { %1084 = vmatpush1.bf16.msra.mxu0 %v3017_v14  ;;  %v3099_v14 = vld [vmem:[%s4314_s2 + $0x3d0] ss:$8 sps:$4 sm:$0xff]  }
  0x52   : > { %1085 = vmatprep.subr.bf16.mxu0 %v3025_v15  ;;  %1278 = vmatpush1.bf16.msra.mxu1 %v3020_v16  ;;  %v3107_v15 = vld [vmem:[%s4314_s2 + $0x3c4] ss:$8 sps:$4 sm:$0xff]   ;;  %v3102_v16 = vld [vmem:[%s4314_s2 + $0x4b0] ss:$8 sps:$4 sm:$0xff]  }
  0x53   : > { %1279 = vmatprep.subr.bf16.mxu1 %v3028_v17  ;;  %v3110_v17 = vld [vmem:[%s4314_s2 + $0x4a4] ss:$8 sps:$4 sm:$0xff]  }
  0x55   : > { %1086 = vmatpush1.bf16.msra.mxu0 %v3023_v18  ;;  %v3105_v18 = vld [vmem:[%s4314_s2 + $0x3c0] ss:$8 sps:$4 sm:$0xff]  }
  0x56   : > { %1087 = vmatprep.subr.bf16.mxu0 %v3031_v19  ;;  %1280 = vmatpush1.bf16.msra.mxu1 %v3026_v20  ;;  %v3113_v19 = vld [vmem:[%s4314_s2 + $0x3b4] ss:$8 sps:$4 sm:$0xff]   ;;  %v3108_v20 = vld [vmem:[%s4314_s2 + $0x4a0] ss:$8 sps:$4 sm:$0xff]  }
  0x57   : > { %1281 = vmatprep.subr.bf16.mxu1 %v3034_v21  ;;  %v3116_v21 = vld [vmem:[%s4314_s2 + $0x494] ss:$8 sps:$4 sm:$0xff]  }
  0x59   : > { %1088 = vmatpush1.bf16.msra.mxu0 %v3029_v22  ;;  %v3111_v22 = vld [vmem:[%s4314_s2 + $0x3b0] ss:$8 sps:$4 sm:$0xff]  }
  0x5a   : > { %1089 = vmatprep.subr.bf16.mxu0 %v3037_v23  ;;  %1282 = vmatpush1.bf16.msra.mxu1 %v3032_v26  ;;  %v3119_v23 = vld [vmem:[%s4314_s2 + $0x3a4] ss:$8 sps:$4 sm:$0xff]   ;;  %v3117_v26 = vld [vmem:[%s4314_s2 + $0x3a0] ss:$8 sps:$4 sm:$0xff]  }
  0x5b   : > { %1283 = vmatprep.subr.bf16.mxu1 %v3040_v29  ;;  %v3128_v29 = vld [vmem:[%s4314_s2 + $0x474] ss:$8 sps:$4 sm:$0xff]  }
  0x5d   : > { %1090 = vmatpush1.bf16.msra.mxu0 %v3035_v30  ;;  %v3123_v30 = vld [vmem:[%s4314_s2 + $0x390] ss:$8 sps:$4 sm:$0xff]  }
  0x5e   : > { %1091 = vmatprep.subr.bf16.mxu0 %v3043_v31  ;;  %1284 = vmatpush1.bf16.msra.mxu1 %v3038_v32  ;;  %v3131_v31 = vld [vmem:[%s4314_s2 + $0x384] ss:$8 sps:$4 sm:$0xff]   ;;  %v3126_v32 = vld [vmem:[%s4314_s2 + $0x470] ss:$8 sps:$4 sm:$0xff]  }
  0x5f   : > { %1285 = vmatprep.subr.bf16.mxu1 %v3046_v34  ;;  %v3134_v34 = vld [vmem:[%s4314_s2 + $0x464] ss:$8 sps:$4 sm:$0xff]  }
  0x61   : > { %1092 = vmatpush1.bf16.msra.mxu0 %v3041_v33  ;;  %v3129_v33 = vld [vmem:[%s4314_s2 + $0x380] ss:$8 sps:$4 sm:$0xff]  }
  0x62   : > { %2662 = vmatprep.subr.msk.bf16.mxu0 %vm682_vm0, %v3047_v35  ;;  %1286 = vmatpush1.bf16.msra.mxu1 %v3044_v37  ;;  %v3135_v35 = vld [vmem:[%s4314_s2 + $0x454] ss:$8 sps:$4 sm:$0x7f]   ;;  %v3132_v37 = vld [vmem:[%s4314_s2 + $0x460] ss:$8 sps:$4 sm:$0xff]  }
  0x63   : > { %2694 = vmatprep.subr.msk.bf16.mxu1 %vm682_vm0, %v3050_v38  ;;  %v3138_v38 = vld [vmem:[%s4314_s2 + $0x534] ss:$8 sps:$4 sm:$0x7f]  }
  0x65   : > { %1098 = vmatpush2.bf16.msra.mxu0 %v1072_v40  ;;  %v1460_v40 = vsel %vm682_vm0, %v3137_v36, 0  ;;  %v3225_v36 = vld [vmem:[%s4314_s2 + $0x610] ss:$8 sps:$4 sm:$0x7f]  }
  0x66   : > { %1099 = vmatprep.subr.bf16.mxu0 %v3055_v41  ;;  %1292 = vmatpush2.bf16.msra.mxu1 %v1266_v42  ;;  %v3143_v41 = vld [vmem:[%s4314_s2 + $0x444] ss:$8 sps:$4 sm:$0xff]   ;;  %v1654_v42 = vsel %vm682_vm0, %v3140_v39, 0  ;;  %v3228_v39 = vld [vmem:[%s4314_s2 + $0x6f0] ss:$8 sps:$4 sm:$0x7f]  }
  0x67   : > { %1293 = vmatprep.subr.bf16.mxu1 %v3058_v43  ;;  %v3146_v43 = vld [vmem:[%s4314_s2 + $0x524] ss:$8 sps:$4 sm:$0xff]  }
  0x69   : > { %1100 = vmatpush2.bf16.msra.mxu0 %v3053_v44  ;;  %v3141_v44 = vld [vmem:[%s4314_s2 + $0x440] ss:$8 sps:$4 sm:$0xff]  }
  0x6a   : > { %1101 = vmatprep.subr.bf16.mxu0 %v3061_v45  ;;  %1294 = vmatpush2.bf16.msra.mxu1 %v3056_v46  ;;  %v3149_v45 = vld [vmem:[%s4314_s2 + $0x434] ss:$8 sps:$4 sm:$0xff]   ;;  %v3144_v46 = vld [vmem:[%s4314_s2 + $0x520] ss:$8 sps:$4 sm:$0xff]  }
  0x6b   : > { %1295 = vmatprep.subr.bf16.mxu1 %v3064_v47  ;;  %v3152_v47 = vld [vmem:[%s4314_s2 + $0x514] ss:$8 sps:$4 sm:$0xff]  }
  0x6d   : > { %1102 = vmatpush2.bf16.msra.mxu0 %v3059_v48  ;;  %v3147_v48 = vld [vmem:[%s4314_s2 + $0x430] ss:$8 sps:$4 sm:$0xff]  }
  0x6e   : > { %1103 = vmatprep.subr.bf16.mxu0 %v3067_v49  ;;  %1296 = vmatpush2.bf16.msra.mxu1 %v3062_v50  ;;  %v3155_v49 = vld [vmem:[%s4314_s2 + $0x424] ss:$8 sps:$4 sm:$0xff]   ;;  %v3150_v50 = vld [vmem:[%s4314_s2 + $0x510] ss:$8 sps:$4 sm:$0xff]  }
  0x6f   : > { %1297 = vmatprep.subr.bf16.mxu1 %v3070_v51  ;;  %v3158_v51 = vld [vmem:[%s4314_s2 + $0x504] ss:$8 sps:$4 sm:$0xff]  }
  0x71   : > { %1104 = vmatpush2.bf16.msra.mxu0 %v3065_v52  ;;  %v3153_v52 = vld [vmem:[%s4314_s2 + $0x420] ss:$8 sps:$4 sm:$0xff]  }
  0x72   : > { %1105 = vmatprep.subr.bf16.mxu0 %v3073_v53  ;;  %1298 = vmatpush2.bf16.msra.mxu1 %v3068_v54  ;;  %v3161_v53 = vld [vmem:[%s4314_s2 + $0x414] ss:$8 sps:$4 sm:$0xff]   ;;  %v3156_v54 = vld [vmem:[%s4314_s2 + $0x500] ss:$8 sps:$4 sm:$0xff]  }
  0x73   : > { %1299 = vmatprep.subr.bf16.mxu1 %v3076_v55  ;;  %v3164_v55 = vld [vmem:[%s4314_s2 + $0x4f4] ss:$8 sps:$4 sm:$0xff]  }
  0x75   : > { %1106 = vmatpush2.bf16.msra.mxu0 %v3071_v56  ;;  %v3159_v56 = vld [vmem:[%s4314_s2 + $0x410] ss:$8 sps:$4 sm:$0xff]  }
  0x76   : > { %1107 = vmatprep.subr.bf16.mxu0 %v3079_v57  ;;  %1300 = vmatpush2.bf16.msra.mxu1 %v3074_v58  ;;  %v3167_v57 = vld [vmem:[%s4314_s2 + $0x404] ss:$8 sps:$4 sm:$0xff]   ;;  %v3162_v58 = vld [vmem:[%s4314_s2 + $0x4f0] ss:$8 sps:$4 sm:$0xff]  }
  0x77   : > { %1301 = vmatprep.subr.bf16.mxu1 %v3082_v59  ;;  %v3170_v59 = vld [vmem:[%s4314_s2 + $0x4e4] ss:$8 sps:$4 sm:$0xff]  }
  0x79   : > { %1108 = vmatpush2.bf16.msra.mxu0 %v3077_v60  ;;  %v3165_v60 = vld [vmem:[%s4314_s2 + $0x400] ss:$8 sps:$4 sm:$0xff]  }
  0x7a   : > { %1465 = vmatprep.subr.bf16.mxu0 %v3088_v61  ;;  %1302 = vmatpush2.bf16.msra.mxu1 %v3080_v62  ;;  %v3168_v61 = vld [vmem:[%s4314_s2 + $0x4e0] ss:$8 sps:$4 sm:$0xff]   ;;  %v3176_v62 = vld [vmem:[%s4314_s2 + $0x5b4] ss:$8 sps:$4 sm:$0xff]  }
  0x7b   : > { %1659 = vmatprep.subr.bf16.mxu1 %v3092_v0  ;;  %v3180_v0 = vld [vmem:[%s4314_s2 + $0x694] ss:$8 sps:$4 sm:$0xff]  }
  0x7c   : > { %1110 = vmatmul.mubr.bf16.vlgmr.msra.gmra.mxu0 %v2632_v63  ;;  %v3926_v63 = vld [vmem:[%s3490_s12 + $0x30] sm:$0xff] }
  0x7d   : > { %1466 = vmatpush1.bf16.msra.mxu0 %v3086_v1  ;;  %1304 = vmatmul.mubr.bf16.vlgmr.msra.gmra.mxu1 %v2664_v2  ;;  %v2696_v1 = vcombine.low %v3757_v6, %v3757_v6  ;;  %v3934_v2 = vld [vmem:[%s3490_s12 + $0x38] sm:$0xff] }
  0x7e   : > { %1467 = vmatprep.subr.bf16.mxu0 %v3095_v3  ;;  %1660 = vmatpush1.bf16.msra.mxu1 %v3090_v4  ;;  %v3174_v3 = vld [vmem:[%s4314_s2 + $0x5b0] ss:$8 sps:$4 sm:$0xff]   ;;  %v2761_v4 = vcombine.high %v3926_v63, %v3926_v63 }
  0x7f   : > { %2727 = vmatprep.mubr.msk.bf16.mxu0 %vm678_vm1, %v2697_v9  ;;  %1661 = vmatprep.subr.bf16.mxu1 %v3098_v5  ;;  %v2728_v5 = vcombine.low %v3760_v7, %v3760_v7  ;;  %v3178_v6 = vld [vmem:[%s4314_s2 + $0x690] ss:$8 sps:$4 sm:$0xff]   ;;  %v2793_v9 = vcombine.high %v3934_v2, %v3934_v2  ;;  %v3181_v7 = vld [vmem:[%s4314_s2 + $0x5a0] ss:$8 sps:$4 sm:$0xff]  }
  0x80   : > { %2759 = vmatprep.mubr.msk.bf16.mxu1 %vm678_vm1, %v2729_v10  ;;  %v3186_v10 = vld [vmem:[%s4314_s2 + $0x684] ss:$8 sps:$4 sm:$0xff]  }
  0x81   : > { %1468 = vmatpush1.bf16.msra.mxu0 %v3093_v8  ;;  %v3183_v8 = vld [vmem:[%s4314_s2 + $0x5a4] ss:$8 sps:$4 sm:$0xff]  }
  0x82   : > { %1469 = vmatprep.subr.bf16.mxu0 %v3101_v11  ;;  %1662 = vmatpush1.bf16.msra.mxu1 %v3096_v12  ;;  %v3189_v11 = vld [vmem:[%s4314_s2 + $0x594] ss:$8 sps:$4 sm:$0xff]   ;;  %v3184_v12 = vld [vmem:[%s4314_s2 + $0x680] ss:$8 sps:$4 sm:$0xff]  }
  0x83   : > { %1663 = vmatprep.subr.bf16.mxu1 %v3104_v13  ;;  %v3192_v13 = vld [vmem:[%s4314_s2 + $0x674] ss:$8 sps:$4 sm:$0xff]  }
  0x85   : > { %1470 = vmatpush1.bf16.msra.mxu0 %v3099_v14  ;;  %v3187_v14 = vld [vmem:[%s4314_s2 + $0x590] ss:$8 sps:$4 sm:$0xff]  }
  0x86   : > { %1471 = vmatprep.subr.bf16.mxu0 %v3107_v15  ;;  %1664 = vmatpush1.bf16.msra.mxu1 %v3102_v16  ;;  %v3195_v15 = vld [vmem:[%s4314_s2 + $0x584] ss:$8 sps:$4 sm:$0xff]   ;;  %v3190_v16 = vld [vmem:[%s4314_s2 + $0x670] ss:$8 sps:$4 sm:$0xff]  }
  0x87   : > { %1665 = vmatprep.subr.bf16.mxu1 %v3110_v17  ;;  %v3198_v17 = vld [vmem:[%s4314_s2 + $0x664] ss:$8 sps:$4 sm:$0xff]  }
  0x89   : > { %1472 = vmatpush1.bf16.msra.mxu0 %v3105_v18  ;;  %v3193_v18 = vld [vmem:[%s4314_s2 + $0x580] ss:$8 sps:$4 sm:$0xff]  }
  0x8a   : > { %1473 = vmatprep.subr.bf16.mxu0 %v3113_v19  ;;  %1666 = vmatpush1.bf16.msra.mxu1 %v3108_v20  ;;  %v3201_v19 = vld [vmem:[%s4314_s2 + $0x574] ss:$8 sps:$4 sm:$0xff]   ;;  %v3196_v20 = vld [vmem:[%s4314_s2 + $0x660] ss:$8 sps:$4 sm:$0xff]  }
  0x8b   : > { %1667 = vmatprep.subr.bf16.mxu1 %v3116_v21  ;;  %v3204_v21 = vld [vmem:[%s4314_s2 + $0x654] ss:$8 sps:$4 sm:$0xff]  }
  0x8d   : > { %1474 = vmatpush1.bf16.msra.mxu0 %v3111_v22  ;;  %v3199_v22 = vld [vmem:[%s4314_s2 + $0x570] ss:$8 sps:$4 sm:$0xff]  }
  0x8e   : > { %1475 = vmatprep.subr.bf16.mxu0 %v3119_v23  ;;  %1668 = vmatpush1.bf16.msra.mxu1 %v3114_v24  ;;  %v3207_v23 = vld [vmem:[%s4314_s2 + $0x564] ss:$8 sps:$4 sm:$0xff]   ;;  %v3202_v24 = vld [vmem:[%s4314_s2 + $0x650] ss:$8 sps:$4 sm:$0xff]  }
  0x8f   : > { %1669 = vmatprep.subr.bf16.mxu1 %v3122_v25  ;;  %v3210_v25 = vld [vmem:[%s4314_s2 + $0x644] ss:$8 sps:$4 sm:$0xff]  }
  0x91   : > { %1476 = vmatpush1.bf16.msra.mxu0 %v3117_v26  ;;  %v3205_v26 = vld [vmem:[%s4314_s2 + $0x560] ss:$8 sps:$4 sm:$0xff]  }
  0x92   : > { %1477 = vmatprep.subr.bf16.mxu0 %v3125_v27  ;;  %1670 = vmatpush1.bf16.msra.mxu1 %v3120_v28  ;;  %v3213_v27 = vld [vmem:[%s4314_s2 + $0x554] ss:$8 sps:$4 sm:$0xff]   ;;  %v3208_v28 = vld [vmem:[%s4314_s2 + $0x640] ss:$8 sps:$4 sm:$0xff]  }
  0x93   : > { %1671 = vmatprep.subr.bf16.mxu1 %v3128_v29  ;;  %v3216_v29 = vld [vmem:[%s4314_s2 + $0x634] ss:$8 sps:$4 sm:$0xff]  }
  0x95   : > { %1478 = vmatpush1.bf16.msra.mxu0 %v3123_v30  ;;  %v3211_v30 = vld [vmem:[%s4314_s2 + $0x550] ss:$8 sps:$4 sm:$0xff]  }
  0x96   : > { %1479 = vmatprep.subr.bf16.mxu0 %v3131_v31  ;;  %1672 = vmatpush1.bf16.msra.mxu1 %v3126_v32  ;;  %v3219_v31 = vld [vmem:[%s4314_s2 + $0x544] ss:$8 sps:$4 sm:$0xff]   ;;  %v3214_v32 = vld [vmem:[%s4314_s2 + $0x630] ss:$8 sps:$4 sm:$0xff]  }
  0x97   : > { %1673 = vmatprep.subr.bf16.mxu1 %v3134_v34  ;;  %v3217_v34 = vld [vmem:[%s4314_s2 + $0x540] ss:$8 sps:$4 sm:$0xff]  }
  0x99   : > { %1480 = vmatpush1.bf16.msra.mxu0 %v3129_v33  ;;  %v3222_v33 = vld [vmem:[%s4314_s2 + $0x624] ss:$8 sps:$4 sm:$0xff]  }
  0x9a   : > { %2726 = vmatprep.subr.msk.bf16.mxu0 %vm682_vm0, %v3135_v35  ;;  %1674 = vmatpush1.bf16.msra.mxu1 %v3132_v37  ;;  %v3223_v35 = vld [vmem:[%s4314_s2 + $0x614] ss:$8 sps:$4 sm:$0x7f]   ;;  %v3220_v37 = vld [vmem:[%s4314_s2 + $0x620] ss:$8 sps:$4 sm:$0xff]  }
  0x9b   : > { %2758 = vmatprep.subr.msk.bf16.mxu1 %vm682_vm0, %v3138_v38  ;;  %v3226_v38 = vld [vmem:[%s4314_s2 + $0x6f4] ss:$8 sps:$4 sm:$0x7f]  }
  0x9d   : > { %1486 = vmatpush2.bf16.msra.mxu0 %v1460_v40  ;;  %v1848_v40 = vsel %vm682_vm0, %v3225_v36, 0  ;;  %v3295_v36 = vld [vmem:[%s4314_s2 + $0x7b4] ss:$8 sps:$4 sm:$0xff]  }
  0x9e   : > { %1487 = vmatprep.subr.bf16.mxu0 %v3143_v41  ;;  %1680 = vmatpush2.bf16.msra.mxu1 %v1654_v42  ;;  %v3231_v41 = vld [vmem:[%s4314_s2 + $0x604] ss:$8 sps:$4 sm:$0xff]   ;;  %v2042_v42 = vsel %vm682_vm0, %v3228_v39, 0  ;;  %v3296_v39 = vld [vmem:[%s4314_s2 + $0x7a0] ss:$8 sps:$4 sm:$0xff]  }
  0x9f   : > { %1681 = vmatprep.subr.bf16.mxu1 %v3146_v43  ;;  %v3234_v43 = vld [vmem:[%s4314_s2 + $0x6e4] ss:$8 sps:$4 sm:$0xff]  }
  0xa1   : > { %1488 = vmatpush2.bf16.msra.mxu0 %v3141_v44  ;;  %v3229_v44 = vld [vmem:[%s4314_s2 + $0x600] ss:$8 sps:$4 sm:$0xff]  }
  0xa2   : > { %1489 = vmatprep.subr.bf16.mxu0 %v3149_v45  ;;  %1682 = vmatpush2.bf16.msra.mxu1 %v3144_v46  ;;  %v3237_v45 = vld [vmem:[%s4314_s2 + $0x5f4] ss:$8 sps:$4 sm:$0xff]   ;;  %v3232_v46 = vld [vmem:[%s4314_s2 + $0x6e0] ss:$8 sps:$4 sm:$0xff]  }
  0xa3   : > { %1683 = vmatprep.subr.bf16.mxu1 %v3152_v47  ;;  %v3240_v47 = vld [vmem:[%s4314_s2 + $0x6d4] ss:$8 sps:$4 sm:$0xff]  }
  0xa5   : > { %1490 = vmatpush2.bf16.msra.mxu0 %v3147_v48  ;;  %v3235_v48 = vld [vmem:[%s4314_s2 + $0x5f0] ss:$8 sps:$4 sm:$0xff]  }
  0xa6   : > { %1491 = vmatprep.subr.bf16.mxu0 %v3155_v49  ;;  %1684 = vmatpush2.bf16.msra.mxu1 %v3150_v50  ;;  %v3243_v49 = vld [vmem:[%s4314_s2 + $0x5e4] ss:$8 sps:$4 sm:$0xff]   ;;  %v3238_v50 = vld [vmem:[%s4314_s2 + $0x6d0] ss:$8 sps:$4 sm:$0xff]  }
  0xa7   : > { %1685 = vmatprep.subr.bf16.mxu1 %v3158_v51  ;;  %v3246_v51 = vld [vmem:[%s4314_s2 + $0x6c4] ss:$8 sps:$4 sm:$0xff]  }
  0xa9   : > { %1492 = vmatpush2.bf16.msra.mxu0 %v3153_v52  ;;  %v3241_v52 = vld [vmem:[%s4314_s2 + $0x5e0] ss:$8 sps:$4 sm:$0xff]  }
  0xaa   : > { %1493 = vmatprep.subr.bf16.mxu0 %v3161_v53  ;;  %1686 = vmatpush2.bf16.msra.mxu1 %v3156_v54  ;;  %v3249_v53 = vld [vmem:[%s4314_s2 + $0x5d4] ss:$8 sps:$4 sm:$0xff]   ;;  %v3244_v54 = vld [vmem:[%s4314_s2 + $0x6c0] ss:$8 sps:$4 sm:$0xff]  }
  0xab   : > { %1687 = vmatprep.subr.bf16.mxu1 %v3164_v55  ;;  %v3252_v55 = vld [vmem:[%s4314_s2 + $0x6b4] ss:$8 sps:$4 sm:$0xff]  }
  0xad   : > { %1494 = vmatpush2.bf16.msra.mxu0 %v3159_v56  ;;  %v3247_v56 = vld [vmem:[%s4314_s2 + $0x5d0] ss:$8 sps:$4 sm:$0xff]  }
  0xae   : > { %1495 = vmatprep.subr.bf16.mxu0 %v3167_v57  ;;  %1688 = vmatpush2.bf16.msra.mxu1 %v3162_v58  ;;  %v3255_v57 = vld [vmem:[%s4314_s2 + $0x5c4] ss:$8 sps:$4 sm:$0xff]   ;;  %v3250_v58 = vld [vmem:[%s4314_s2 + $0x6b0] ss:$8 sps:$4 sm:$0xff]  }
  0xaf   : > { %1689 = vmatprep.subr.bf16.mxu1 %v3170_v59  ;;  %v3258_v59 = vld [vmem:[%s4314_s2 + $0x6a4] ss:$8 sps:$4 sm:$0xff]  }
  0xb1   : > { %1496 = vmatpush2.bf16.msra.mxu0 %v3165_v60  ;;  %v3253_v60 = vld [vmem:[%s4314_s2 + $0x5c0] ss:$8 sps:$4 sm:$0xff]  }
  0xb2   : > { %1853 = vmatprep.subr.bf16.mxu0 %v3176_v62  ;;  %1690 = vmatpush2.bf16.msra.mxu1 %v3168_v61  ;;  %v3264_v61 = vld [vmem:[%s4314_s2 + $0x774] ss:$8 sps:$4 sm:$0xff]   ;;  %v4111_v62 = vld [vmem:[%s3490_s12 + $0x40] sm:$0xff] }
  0xb3   : > { %2047 = vmatprep.subr.bf16.mxu1 %v3180_v0  ;;  %v3256_v0 = vld [vmem:[%s4314_s2 + $0x6a0] ss:$8 sps:$4 sm:$0xff]  }
  0xb4   : > { %1498 = vmatmul.mubr.bf16.vlgmr.msra.gmra.mxu0 %v2696_v1  ;;  %v2760_v1 = vcombine.low %v3926_v63, %v3926_v63  ;;  %v3266_v63 = vld [vmem:[%s4314_s2 + $0x760] ss:$8 sps:$4 sm:$0xff]  }
  0xb5   : > { %1854 = vmatpush1.bf16.msra.mxu0 %v3174_v3  ;;  %2791 = vmatprep.mubr.msk.bf16.mxu0 %vm678_vm1, %v2761_v4  ;;  %v3262_v3 = vld [vmem:[%s4314_s2 + $0x770] ss:$8 sps:$4 sm:$0xff]   ;;  %v2825_v4 = vcombine.high %v4111_v62, %v4111_v62 }
  0xb6   : > { %1692 = vmatmul.mubr.bf16.vlgmr.msra.gmra.mxu1 %v2728_v5  ;;  %1855 = vmatprep.subr.bf16.mxu0 %v3183_v8  ;;  %v2792_v5 = vcombine.low %v3934_v2, %v3934_v2  ;;  %v3268_v8 = vld [vmem:[%s4314_s2 + $0x764] ss:$8 sps:$4 sm:$0xff]   ;;  %v3271_v2 = vld [vmem:[%s4314_s2 + $0x754] ss:$8 sps:$4 sm:$0xff]  }
  0xb7   : > { %2048 = vmatpush1.bf16.msra.mxu1 %v3178_v6  ;;  %2823 = vmatprep.mubr.msk.bf16.mxu1 %vm678_vm1, %v2793_v9  ;;  %v3269_v6 = vld [vmem:[%s4314_s2 + $0x750] ss:$8 sps:$4 sm:$0xff]   ;;  %v3274_v9 = vld [vmem:[%s4314_s2 + $0x744] ss:$8 sps:$4 sm:$0xff]  }
  0xb8   : > { %2049 = vmatprep.subr.bf16.mxu1 %v3186_v10  ;;  %v3272_v10 = vld [vmem:[%s4314_s2 + $0x740] ss:$8 sps:$4 sm:$0xff]  }
  0xb9   : > { %1856 = vmatpush1.bf16.msra.mxu0 %v3181_v7  ;;  %v3277_v7 = vld [vmem:[%s4314_s2 + $0x734] ss:$8 sps:$4 sm:$0xff]  }
  0xba   : > { %1857 = vmatprep.subr.bf16.mxu0 %v3189_v11  ;;  %v3275_v11 = vld [vmem:[%s4314_s2 + $0x730] ss:$8 sps:$4 sm:$0xff]  }
  0xbb   : > { %2050 = vmatpush1.bf16.msra.mxu1 %v3184_v12  ;;  %v3280_v12 = vld [vmem:[%s4314_s2 + $0x724] ss:$8 sps:$4 sm:$0xff]  }
  0xbc   : > { %2051 = vmatprep.subr.bf16.mxu1 %v3192_v13  ;;  %v3278_v13 = vld [vmem:[%s4314_s2 + $0x720] ss:$8 sps:$4 sm:$0xff]  }
  0xbd   : > { %1858 = vmatpush1.bf16.msra.mxu0 %v3187_v14  ;;  %v3283_v14 = vld [vmem:[%s4314_s2 + $0x714] ss:$8 sps:$4 sm:$0xff]  }
  0xbe   : > { %1859 = vmatprep.subr.bf16.mxu0 %v3195_v15  ;;  %v3281_v15 = vld [vmem:[%s4314_s2 + $0x710] ss:$8 sps:$4 sm:$0xff]  }
  0xbf   : > { %2052 = vmatpush1.bf16.msra.mxu1 %v3190_v16  ;;  %v2282_v16 = vld [vmem:[%s4163_s13] sm:$0xff] }
  0xc0   : > { %2053 = vmatprep.subr.bf16.mxu1 %v3198_v17  ;;  %v3286_v17 = vld [vmem:[%s4314_s2 + $0x704] ss:$8 sps:$4 sm:$0xff]  }
  0xc1   : > { %1860 = vmatpush1.bf16.msra.mxu0 %v3193_v18 }
  0xc2   : > { %1861 = vmatprep.subr.bf16.mxu0 %v3201_v19  ;;  %v2284_v19 = vld [vmem:[%s4163_s13 + $0x10] sm:$0xff] }
  0xc3   : > { %2054 = vmatpush1.bf16.msra.mxu1 %v3196_v20 }
  0xc4   : > { %2055 = vmatprep.subr.bf16.mxu1 %v3204_v21  ;;  %v3284_v21 = vld [vmem:[%s4314_s2 + $0x700] ss:$8 sps:$4 sm:$0xff]  }
  0xc5   : > { %1862 = vmatpush1.bf16.msra.mxu0 %v3199_v22 }
  0xc6   : > { %1863 = vmatprep.subr.bf16.mxu0 %v3207_v23 }
  0xc7   : > { %2056 = vmatpush1.bf16.msra.mxu1 %v3202_v24  ;;  %v3287_v24 = vld [vmem:[%s4314_s2 + $0x7d4] ss:$8 sps:$4 sm:$0x7f]  }
  0xc8   : > { %2057 = vmatprep.subr.bf16.mxu1 %v3210_v25  ;;  %v3289_v25 = vld [vmem:[%s4314_s2 + $0x7d0] ss:$8 sps:$4 sm:$0x7f]  }
  0xc9   : > { %1864 = vmatpush1.bf16.msra.mxu0 %v3205_v26 }
  0xca   : > { %1865 = vmatprep.subr.bf16.mxu0 %v3213_v27 }
  0xcb   : > { %2058 = vmatpush1.bf16.msra.mxu1 %v3208_v28 }
  0xcc   : > { %2059 = vmatprep.subr.bf16.mxu1 %v3216_v29 }
  0xcd   : > { %1866 = vmatpush1.bf16.msra.mxu0 %v3211_v30 }
  0xce   : > { %1867 = vmatprep.subr.bf16.mxu0 %v3219_v31  ;;  %v2236_v31 = vsel %vm682_vm0, %v3289_v25, 0 }
  0xcf   : > { %2060 = vmatpush1.bf16.msra.mxu1 %v3214_v32  ;;  %v3292_v32 = vld [vmem:[%s4314_s2 + $0x7c4] ss:$8 sps:$4 sm:$0xff]  }
  0xd0   : > { %2061 = vmatprep.subr.bf16.mxu1 %v3222_v33 }
  0xd1   : > { %1868 = vmatpush1.bf16.msra.mxu0 %v3217_v34 }
  0xd2   : > { %2790 = vmatprep.subr.msk.bf16.mxu0 %vm682_vm0, %v3223_v35  ;;  %v3290_v35 = vld [vmem:[%s4314_s2 + $0x7c0] ss:$8 sps:$4 sm:$0xff]  }
  0xd3   : > { %2062 = vmatpush1.bf16.msra.mxu1 %v3220_v37  ;;  %v3293_v37 = vld [vmem:[%s4314_s2 + $0x7b0] ss:$8 sps:$4 sm:$0xff]  }
  0xd4   : > { %2822 = vmatprep.subr.msk.bf16.mxu1 %vm682_vm0, %v3226_v38  ;;  %v3298_v38 = vld [vmem:[%s4314_s2 + $0x7a4] ss:$8 sps:$4 sm:$0xff]  }
  0xd5   : > { %1874 = vmatpush2.bf16.msra.mxu0 %v1848_v40  ;;  %v3301_v40 = vld [vmem:[%s4314_s2 + $0x794] ss:$8 sps:$4 sm:$0xff]  }
  0xd6   : > { %1875 = vmatprep.subr.bf16.mxu0 %v3231_v41  ;;  %v3299_v41 = vld [vmem:[%s4314_s2 + $0x790] ss:$8 sps:$4 sm:$0xff]  }
  0xd7   : > { %2068 = vmatpush2.bf16.msra.mxu1 %v2042_v42  ;;  %v3304_v42 = vld [vmem:[%s4314_s2 + $0x784] ss:$8 sps:$4 sm:$0xff]  }
  0xd8   : > { %2069 = vmatprep.subr.bf16.mxu1 %v3234_v43  ;;  %v3302_v43 = vld [vmem:[%s4314_s2 + $0x780] ss:$8 sps:$4 sm:$0xff]  }
  0xd9   : > { %1876 = vmatpush2.bf16.msra.mxu0 %v3229_v44  ;;  %v2824_v44 = vcombine.low %v4111_v62, %v4111_v62 }
  0xda   : > { %1877 = vmatprep.subr.bf16.mxu0 %v3237_v45  ;;  %v3318_v45 = vmov 0  }
  0xdb   : > { %2070 = vmatpush2.bf16.msra.mxu1 %v3232_v46  ;;  %2910 = vset.pattern.permute.xlu0 %v3318_v45  ;;  %v2285_v46 = vld [vmem:[%s4163_s13 + $0x18] sm:$0xff] }
  0xdc   : > { %2071 = vmatprep.subr.bf16.mxu1 %v3240_v47  ;;  %v2286_v47 = vld [vmem:[%s4163_s13 + $0x20] sm:$0xff] }
  0xdd   : > { %1878 = vmatpush2.bf16.msra.mxu0 %v3235_v48 }
  0xde   : > { %1879 = vmatprep.subr.bf16.mxu0 %v3243_v49  ;;  %v2288_v49 = vld [vmem:[%s4163_s13 + $0x30] sm:$0xff] }
  0xdf   : > { %2072 = vmatpush2.bf16.msra.mxu1 %v3238_v50  ;;  %v2287_v50 = vld [vmem:[%s4163_s13 + $0x28] sm:$0xff] }
  0xe0   : > { %2073 = vmatprep.subr.bf16.mxu1 %v3246_v51 }
  0xe1   : > { %1880 = vmatpush2.bf16.msra.mxu0 %v3241_v52 }
  0xe2   : > { %1881 = vmatprep.subr.bf16.mxu0 %v3249_v53 }
  0xe3   : > { %2074 = vmatpush2.bf16.msra.mxu1 %v3244_v54 }
  0xe4   : > { %2075 = vmatprep.subr.bf16.mxu1 %v3252_v55 }
  0xe5   : > { %1882 = vmatpush2.bf16.msra.mxu0 %v3247_v56 }
  0xe6   : > { %1883 = vmatprep.subr.bf16.mxu0 %v3255_v57 }
  0xe7   : > { %2076 = vmatpush2.bf16.msra.mxu1 %v3250_v58 }
  0xe8   : > { %2077 = vmatprep.subr.bf16.mxu1 %v3258_v59 }
  0xe9   : > { %1884 = vmatpush2.bf16.msra.mxu0 %v3253_v60 }
  0xea   : > { %2241 = vmatprep.subr.bf16.mxu0 %v3264_v61 }
  0xeb   : > { %2078 = vmatpush2.bf16.msra.mxu1 %v3256_v0 }
  0xec   : > { %1886 = vmatmul.mubr.bf16.vlgmr.msra.gmra.mxu0 %v2760_v1  ;;  %2354 = vmatprep.subr.bf16.mxu1 %v3318_v45  ;;  %v2290_v1 = vld [vmem:[%s4163_s13 + $0x40] sm:$0xff] }
  0xed   : > { %2242 = vmatpush1.bf16.msra.mxu0 %v3262_v3  ;;  %2855 = vmatprep.mubr.msk.bf16.mxu0 %vm678_vm1, %v2825_v4  ;;  %v2292_v4 = vld [vmem:[%s4163_s13 + $0x50] sm:$0xff] }
  0xee   : > { %2080 = vmatmul.mubr.bf16.vlgmr.msra.gmra.mxu1 %v2792_v5  ;;  %2243 = vmatprep.subr.bf16.mxu0 %v3268_v8 }
  0xf1   : > { %2244 = vmatpush1.bf16.msra.mxu0 %v3266_v63 }
  0xf2   : > { %2245 = vmatprep.subr.bf16.mxu0 %v3271_v2 }
  0xf5   : > { %2246 = vmatpush1.bf16.msra.mxu0 %v3269_v6 }
  0xf6   : > { %2247 = vmatprep.subr.bf16.mxu0 %v3274_v9 }
  0xf9   : > { %2248 = vmatpush1.bf16.msra.mxu0 %v3272_v10 }
  0xfa   : > { %2249 = vmatprep.subr.bf16.mxu0 %v3277_v7 }
  0xfd   : > { %2250 = vmatpush1.bf16.msra.mxu0 %v3275_v11 }
  0xfe   : > { %2251 = vmatprep.subr.bf16.mxu0 %v3280_v12 }
 0x101   : > { %2252 = vmatpush1.bf16.msra.mxu0 %v3278_v13  ;;  %v3307_v13 = vld [vmem:[%s4315_s3 + $0x4] ss:$8 sps:$4 sm:$0xff]  }
 0x102   : > { %2253 = vmatprep.subr.bf16.mxu0 %v3283_v14  ;;  %2858 = vmatprep.mubr.msk.bf16.mxu1 %vm2350_vm2, %v3307_v13  ;;  %v2329_v14 = vld [vmem:[%s4316_s4] sm:$0xff] }
 0x103   : > { %2333 = vperm.xlu0 %2910, %v2329_v14  }
 0x104   : > { %v723_v18 = vpop.f32.mrf.mxu0 }
 0x105   : > { %v4173_v20 = vadd.f32 %v2282_v16, %v723_v18  ;;  %2254 = vmatpush1.bf16.msra.mxu0 %v3281_v15  ;;  %v917_v22 = vpop.f32.mrf.mxu1  ;;  %v2330_v15 = vld [vmem:[%s4316_s4 + $0x8] sm:$0xff]  ;;  %v2293_v16 = vld [vmem:[%s4163_s13 + $0x58] sm:$0xff] }
 0x106   : > { %v4178_v23 = vpop.f32.mrf.mxu0  ;;  %2255 = vmatprep.subr.bf16.mxu0 %v3286_v17  ;;  %v4186_v26 = vadd.f32 %v2284_v19, %v917_v22  ;;  %v2295_v18 = vld [vmem:[%s4163_s13 + $0x68] sm:$0xff] }
 0x107   : > { %v919_v28 = vpop.f32.mrf.mxu1  ;;  %2338 = vperm.xlu0 %2910, %v2330_v15   ;;  %v2291_v22 = vld [vmem:[%s4163_s13 + $0x48] sm:$0xff] }
 0x108   : > { %v727_v27 = vpop.f32.mrf.mxu0  ;;  %v2318_v29 = vpack.c.bf16 %v4186_v26, %v4173_v20  ;;  %v2303_v51 = vadd.f32 %v2285_v46, %v919_v28  ;;  %v2404_v20 = vld [vmem:[%s4317_s5 + $0x38] sm:$0xff]  ;;  %v2403_v26 = vld [vmem:[%s4317_s5 + $0x30] sm:$0xff] }
 0x109   : > { %2256 = vmatpush1.bf16.msra.mxu0 %v3284_v21  ;;  %v921_v33 = vpop.f32.mrf.mxu1  ;;  %v2289_v21 = vld [vmem:[%s4163_s13 + $0x38] sm:$0xff] }
 0x10a   : > { %v728_v30 = vpop.f32.mrf.mxu0  ;;  %2854 = vmatprep.subr.msk.bf16.mxu0 %vm682_vm0, %v3287_v24 }
 0x10b   : > { %v922_v34 = vpop.f32.mrf.mxu1 }
 0x10d   : > { %2262 = vmatpush2.bf16.msra.mxu0 %v2236_v31 }
 0x10e   : > { %2263 = vmatprep.subr.bf16.mxu0 %v3292_v32 }
 0x111   : > { %2264 = vmatpush2.bf16.msra.mxu0 %v3290_v35 }
 0x112   : > { %2265 = vmatprep.subr.bf16.mxu0 %v3295_v36 }
 0x115   : > { %2266 = vmatpush2.bf16.msra.mxu0 %v3293_v37 }
 0x116   : > { %2267 = vmatprep.subr.bf16.mxu0 %v3298_v38  ;;  %v2283_v38 = vld [vmem:[%s4163_s13 + $0x8] sm:$0xff] }
 0x119   : > { %2268 = vmatpush2.bf16.msra.mxu0 %v3296_v39  ;;  %v2298_v39 = vld [vmem:[%s4163_s13 + $0x80] sm:$0xff] }
 0x11a   : > { %2269 = vmatprep.subr.bf16.mxu0 %v3301_v40  ;;  %v2294_v40 = vld [vmem:[%s4163_s13 + $0x60] sm:$0xff] }
 0x11d   : > { %2270 = vmatpush2.bf16.msra.mxu0 %v3299_v41  ;;  %v2296_v41 = vld [vmem:[%s4163_s13 + $0x70] sm:$0xff] }
 0x11e   : > { %2271 = vmatprep.subr.bf16.mxu0 %v3304_v42 }
 0x121   : > { %2272 = vmatpush2.bf16.msra.mxu0 %v3302_v43  ;;  %v2301_v43 = vadd.f32 %v2283_v38, %v4178_v23  ;;  %v2299_v23 = vld [vmem:[%s4163_s13 + $0x88] sm:$0xff] }
 0x124   : > { %2274 = vmatmul.mubr.bf16.vlgmr.msra.gmra.mxu0 %v2824_v44 }
 0x13c   : > { %v1111_v48 = vpop.f32.mrf.mxu0 }
 0x13d   : > { %v4230_v52 = vadd.f32 %v2286_v47, %v1111_v48  ;;  %v1305_v53 = vpop.f32.mrf.mxu1 }
 0x13e   : > { %v1113_v54 = vpop.f32.mrf.mxu0  ;;  %v4232_v55 = vadd.f32 %v2288_v49, %v1305_v53 }
 0x13f   : > { %v2305_v56 = vadd.f32 %v2287_v50, %v1113_v54  ;;  %v1307_v58 = vpop.f32.mrf.mxu1  ;;  %v2297_v54 = vld [vmem:[%s4163_s13 + $0x78] sm:$0xff] }
 0x140   : > { %v1115_v57 = vpop.f32.mrf.mxu0  ;;  %v2319_v59 = vpack.c.bf16 %v4232_v55, %v4230_v52  ;;  %v2307_v31 = vadd.f32 %v2289_v21, %v1307_v58  ;;  %v3309_v52 = vld [vmem:[%s4315_s3] ss:$8 sps:$4 sm:$0xff]  }
 0x141   : > { %v2323_v60 = vpack.c.bf16 %v2305_v56, %v2303_v51  ;;  %v1309_v62 = vpop.f32.mrf.mxu1  ;;  %v2405_v55 = vld [vmem:[%s4317_s5 + $0x40] sm:$0xff] }
 0x142   : > { %v1116_v61 = vpop.f32.mrf.mxu0  ;;  %v2398_v62 = vld [vmem:[%s4317_s5 + $0x8] sm:$0xff] }
 0x143   : > { %v1310_v0 = vpop.f32.mrf.mxu1  ;;  %v2399_v61 = vld [vmem:[%s4317_s5 + $0x10] sm:$0xff] }
 0x144   : > { %v2397_v0 = vld [vmem:[%s4317_s5] sm:$0xff] }
 0x174   : > { %v1499_v3 = vpop.f32.mrf.mxu0 }
 0x175   : > { %v2308_v5 = vadd.f32 %v2290_v1, %v1499_v3 }
 0x176   : > { %v1693_v8 = vpop.f32.mrf.mxu1  ;;  %v1501_v63 = vpop.f32.mrf.mxu0 }
 0x177   : > { %v2310_v2 = vadd.f32 %v2292_v4, %v1693_v8  ;;  %v2309_v32 = vadd.f32 %v2291_v22, %v1501_v63 }
 0x178   : > { %v1503_v6 = vpop.f32.mrf.mxu0  ;;  %v1695_v9 = vpop.f32.mrf.mxu1 }
 0x179   : > { %v2320_v10 = vpack.c.bf16 %v2310_v2, %v2308_v5  ;;  %v2311_v19 = vadd.f32 %v2293_v16, %v1695_v9  ;;  %v2324_v37 = vpack.c.bf16 %v2309_v32, %v2307_v31 }
 0x17a   : > { %v1504_v7 = vpop.f32.mrf.mxu0  ;;  %v1697_v11 = vpop.f32.mrf.mxu1 }
 0x17c   : > { %v1698_v12 = vpop.f32.mrf.mxu1 }
 0x17e   : > { %v2334_v1 = vpop.permute.xlu0 %2333 }
 0x182   : > { %v2339_v63 = vpop.permute.xlu0 %2338 }
 0x1ac   : > { %v1887_v17 = vpop.f32.mrf.mxu0 }
 0x1ad   : > { %v2312_v47 = vadd.f32 %v2294_v40, %v1887_v17 }
 0x1ae   : > { %v2081_v24 = vpop.f32.mrf.mxu1  ;;  %v1889_v25 = vpop.f32.mrf.mxu0 }
 0x1af   : > { %v2313_v27 = vadd.f32 %v2295_v18, %v1889_v25  ;;  %v2314_v48 = vadd.f32 %v2296_v41, %v2081_v24 }
 0x1b0   : > { %v1891_v28 = vpop.f32.mrf.mxu0  ;;  %v2083_v30 = vpop.f32.mrf.mxu1 }
 0x1b1   : > { %v2325_v33 = vpack.c.bf16 %v2313_v27, %v2311_v19  ;;  %v2321_v53 = vpack.c.bf16 %v2314_v48, %v2312_v47  ;;  %v2315_v56 = vadd.f32 %v2297_v54, %v2083_v30 }
 0x1b2   : > { %v1892_v34 = vpop.f32.mrf.mxu0  ;;  %v2085_v35 = vpop.f32.mrf.mxu1 }
 0x1b3   : > { %2355 = vmatpush1.bf16.msra.mxu1 %v2325_v33 }
 0x1b4   : > { %2356 = vmatprep.subr.bf16.mxu1 %v3318_v45  ;;  %v2086_v36 = vpop.f32.mrf.mxu1 }
 0x1b7   : > { %2357 = vmatpush1.bf16.msra.mxu1 %v2324_v37 }
 0x1b8   : > { %2358 = vmatprep.subr.bf16.mxu1 %v3318_v45 }
 0x1bb   : > { %2359 = vmatpush1.bf16.msra.mxu1 %v2323_v60  ;;  %v2406_v60 = vld [vmem:[%s4317_s5 + $0x48] sm:$0xff] }
 0x1bc   : > { %2360 = vmatprep.subr.bf16.mxu1 %v3318_v45 }
 0x1e4   : > { %v2275_v42 = vpop.f32.mrf.mxu0 }
 0x1e5   : > { %v2316_v44 = vadd.f32 %v2298_v39, %v2275_v42 }
 0x1e6   : > { %v2277_v46 = vpop.f32.mrf.mxu0 }
 0x1e7   : > { %v2322_v49 = vpack.c.bf16 %v2301_v43, %v2316_v44  ;;  %v2317_v57 = vadd.f32 %v2299_v23, %v2277_v46 }
 0x1e8   : > { %v2279_v50 = vpop.f32.mrf.mxu0 }
 0x1e9   : > { %2361 = vmatpush1.bf16.msra.mxu1 %v2322_v49  ;;  %v2326_v58 = vpack.c.bf16 %v2317_v57, %v2315_v56 }
 0x1ea   : > { %v2280_v51 = vpop.f32.mrf.mxu0  ;;  %2362 = vmatprep.subr.bf16.mxu1 %v3318_v45 }
 0x1ed   : > { %2363 = vmatpush1.bf16.msra.mxu1 %v2321_v53 }
 0x1ee   : > { %2364 = vmatprep.subr.bf16.mxu1 %v3318_v45 }
 0x1f1   : > { %2365 = vmatpush1.bf16.msra.mxu1 %v2320_v10 }
 0x1f2   : > { %2366 = vmatprep.subr.bf16.mxu1 %v3318_v45 }
 0x1f5   : > { %2367 = vmatpush1.bf16.msra.mxu1 %v2319_v59  ;;  %v2400_v59 = vld [vmem:[%s4317_s5 + $0x18] sm:$0xff] }
 0x1f6   : > { %2368 = vmatprep.subr.bf16.mxu1 %v3318_v45 }
 0x1f9   : > { %2369 = vmatpush1.bf16.msra.mxu1 %v2318_v29  ;;  %v2402_v29 = vld [vmem:[%s4317_s5 + $0x28] sm:$0xff] }
 0x1fa   : > { %2384 = vmatprep.subr.bf16.mxu1 %v3318_v45  ;;  %v2401_v45 = vld [vmem:[%s4317_s5 + $0x20] sm:$0xff] }
 0x1fd   : > { %2385 = vmatpush2.bf16.msra.mxu1 %v2326_v58 }
 0x1fe   : > { %2876 = vmatprep.subr.mxu1 %v2406_v60 }
 0x200   : > { %2387 = vmatmul.mubr.bf16.vlgmr.msra.gmra.mxu1 %v3309_v52 }
 0x201   : > { %2877 = vmatpush3.msra.mxu1 %v2406_v60 }
 0x202   : > { %2878 = vmatprep.subr.mxu1 %v2405_v55 }
 0x203   : > { %2879 = vmatpush3.msra.mxu1 %v2405_v55 }
 0x204   : > { %2880 = vmatprep.subr.mxu1 %v2404_v20 }
 0x205   : > { %2881 = vmatpush3.msra.mxu1 %v2404_v20 }
 0x206   : > { %2882 = vmatprep.subr.mxu1 %v2403_v26 }
 0x207   : > { %2883 = vmatpush3.msra.mxu1 %v2403_v26 }
 0x208   : > { %2884 = vmatprep.subr.mxu1 %v2402_v29 }
 0x209   : > { %2885 = vmatpush3.msra.mxu1 %v2402_v29 }
 0x20a   : > { %2886 = vmatprep.subr.mxu1 %v2401_v45 }
 0x20b   : > { %2887 = vmatpush3.msra.mxu1 %v2401_v45 }
 0x20c   : > { %2888 = vmatprep.subr.mxu1 %v2400_v59 }
 0x20d   : > { %2889 = vmatpush3.msra.mxu1 %v2400_v59 }
 0x20e   : > { %2890 = vmatprep.subr.mxu1 %v2399_v61 }
 0x20f   : > { %2891 = vmatpush3.msra.mxu1 %v2399_v61 }
 0x210   : > { %2892 = vmatprep.subr.mxu1 %v2398_v62 }
 0x211   : > { %2893 = vmatpush3.msra.mxu1 %v2398_v62 }
 0x212   : > { %2894 = vmatprep.subr.mxu1 %v2397_v0 }
 0x213   : > { %2895 = vmatpush3.msra.mxu1 %v2397_v0 }
 0x2c0   : > { %v2388_v3 = vpop.f32.mrf.mxu1 }
 0x2c1   : > { %v2389_v4 = vadd.f32 %v2388_v3, %v2334_v1 }
 0x2c2   : > { %v2390_v5 = vpop.f32.mrf.mxu1 }
 0x2c3   : > { %v2395_v8 = vmax.f32 %v2389_v4, 0.0 }
 0x2c4   : > { %v2391_v2 = vpop.f32.mrf.mxu1 }
 0x2c5   : > { %v2392_v6 = vadd.f32 %v2391_v2, %v2339_v63  ;;  %2896 = vmatprep.mubr.msk.f32.mxu1 %vm2407_vm3, %v2395_v8 }
 0x2c6   : > { %v2393_v9 = vpop.f32.mrf.mxu1 }
 0x2c7   : > { %v2396_v10 = vmax.f32 %v2392_v6, 0.0 }
 0x2c9   : > { %2897 = vmatmul.mubr.msk.f32.vlgmr.msra.gmra.mxu1 %vm2407_vm3, %v2396_v10 }
 0x389   : > { %v2898_v7 = vpop.f32.mrf.mxu1 }
 0x38a   : > { %2491 = vst.msk [vmem:[%s271_s9 + $0x8] sm:$0xff] %vm2489_vm4, %v2898_v7 }
 0x38b   : > { %v2480_v11 = vpop.f32.mrf.mxu1 }
 0x38c   : > { %2490 = vst.msk [vmem:[%s271_s9] sm:$0xff] %vm2489_vm4, %v2480_v11 }
 0x38d PF: > { %s16_s21 = sadd.s32 1, %s3316_s21  }
 0x38e   : > { %p13_p4 = scmp.ge.s32.totalorder %s16_s21, 4  }
 0x390   :  { %15 = sbr.rel (!%p13_p4) target bundleno = 1 (0x1), region = 77 }

</bundles_post_ra>
